<compile_context>
chip_gen: v7x
topology: tpu7x:2x2x1
jax: 0.10.0
libtpu: 0.0.40
codegen_flags: <defaults>
</compile_context>

<pallas_src>
import jax
import jax.numpy as jnp
from jax.experimental import pallas as pl
from jax.experimental.pallas import tpu as pltpu


# ---------------------------------------------------------------------------
# Small helpers
# ---------------------------------------------------------------------------
def _round_up(n, m):
    return ((n + m - 1) // m) * m


def _pick_block(n, batch, target=2048):
    """Pick a lane block bn (multiple of 128) that divides the (possibly
    padded) column count, preferring large blocks.  Padding is only needed
    when n is not a multiple of 128 (fallback path)."""
    npad = n if n % 128 == 0 else _round_up(n, 128)
    bn = 128
    m = 256
    while m <= min(npad, target):
        if npad % m == 0:
            bn = m
        m += 128
    # Keep the grid >= 2 steps so both v7x TensorCores get work
    # (harmless on single-TC v5e / v6e).
    if batch * (npad // bn) < 2 and bn % 256 == 0:
        bn //= 2
    return bn, npad


def _pad_last(t, npad):
    n = t.shape[-1]
    if npad == n:
        return t
    return jnp.pad(t, ((0, 0), (0, 0), (0, npad - n)))


def _mix(w, x):
    """Channel mix (1x1 conv): (C_out, C_in) x (C_in, TN) -> (C_out, TN).

    For tiny channel counts (FU: C=4) use unrolled VPU broadcast-FMA; the
    contraction is far too shallow to feed the MXU.  Larger C -> MXU."""
    c_in = x.shape[0]
    if c_in < 16:
        acc = w[:, 0:1] * x[0:1, :]
        for c in range(1, c_in):
            acc = acc + w[:, c:c + 1] * x[c:c + 1, :]
        return acc
    return jnp.dot(w, x, preferred_element_type=jnp.float32)


# ---------------------------------------------------------------------------
# Capability probe: does jnp.arctan2 lower inside a Pallas TPU kernel?
# If yes, the angle is computed in-kernel (removes the XLA angle pass);
# otherwise jnp.angle stays in XLA and the kernel receives (mag, pha).
# ---------------------------------------------------------------------------
_ATAN2_SUPPORTED = None


def _atan2_in_kernel():
    global _ATAN2_SUPPORTED
    if _ATAN2_SUPPORTED is None:
        def probe(a_ref, b_ref, o_ref):
            o_ref[...] = jnp.arctan2(a_ref[...], b_ref[...])
        try:
            fn = pl.pallas_call(
                probe, out_shape=jax.ShapeDtypeStruct((8, 128), jnp.float32))
            z = jax.ShapeDtypeStruct((8, 128), jnp.float32)
            jax.jit(fn).lower(z, z).compile()
            _ATAN2_SUPPORTED = True
        except Exception:
            _ATAN2_SUPPORTED = False
    return _ATAN2_SUPPORTED


# ---------------------------------------------------------------------------
# Kernel 1: fused abs/angle + amp_fuse + pha_fuse + complex reconstruction.
# Input x_ref:  (2C, TN)  = [re ; im]  (or [mag ; pha] on the fallback path)
# Input w_ref:  (2C, 2C+2) packed weights  rows 0:C amp branch, C:2C pha branch
#               cols [0:C]=w1, [C]=b1, [C+1:2C+1]=w2, [2C+1]=b2
# Output o_ref: (2C, TN)  = [Mag*cos(Pha) ; Mag*sin(Pha)]
# ---------------------------------------------------------------------------
def _make_fuse_kernel(C, reim_input):
    def kernel(x_ref, w_ref, o_ref):
        slope = jnp.float32(0.1)
        x = x_ref[...]
        wp = w_ref[...]

        a = x[0:C, :]
        b = x[C:2 * C, :]
        if reim_input:
            mag = jnp.sqrt(a * a + b * b)          # |fft|
            pha = jnp.arctan2(b, a)                # angle(fft)
        else:
            mag, pha = a, b                        # already abs/angle (XLA)

        def branch(v, w1, b1, w2, b2):
            h = _mix(w1, v) + b1
            h = jnp.where(h > 0, h, slope * h)     # LeakyReLU(0.1)
            return _mix(w2, h) + b2

        wa1 = wp[0:C, 0:C];            ba1 = wp[0:C, C:C + 1]
        wa2 = wp[0:C, C + 1:2 * C + 1]; ba2 = wp[0:C, 2 * C + 1:2 * C + 2]
        wp1 = wp[C:2 * C, 0:C];         bp1 = wp[C:2 * C, C:C + 1]
        wp2 = wp[C:2 * C, C + 1:2 * C + 1]; bp2 = wp[C:2 * C, 2 * C + 1:2 * C + 2]

        Mag = branch(mag, wa1, ba1, wa2, ba2)
        Pha = branch(pha, wp1, bp1, wp2, bp2)
        real = Mag * jnp.cos(Pha)
        imag = Mag * jnp.sin(Pha)
        # One fully dense (2C = 8)-sublane store instead of two half tiles.
        o_ref[...] = jnp.concatenate([real, imag], axis=0).astype(o_ref.dtype)
    return kernel


def fu_fuse(x_b2cn, w_pack, C, *, reim_input, target_cols=2048):
    B, C2, N = x_b2cn.shape
    assert C2 == 2 * C
    bn, npad = _pick_block(N, B, target_cols)
    xp = _pad_last(x_b2cn, npad)

    blk = pl.BlockSpec((None, C2, bn), lambda b, i: (b, 0, i))
    out = pl.pallas_call(
        _make_fuse_kernel(C, reim_input),
        out_shape=jax.ShapeDtypeStruct((B, C2, npad), jnp.float32),
        grid_spec=pltpu.PrefetchScalarGridSpec(
            num_scalar_prefetch=0,
            grid=(B, npad // bn),
            in_specs=[blk,
                      pl.BlockSpec(w_pack.shape, lambda b, i: (0, 0))],
            out_specs=blk,
        ),
        compiler_params=pltpu.CompilerParams(
            dimension_semantics=("parallel", "parallel")),
    )(xp, w_pack)
    return out if npad == N else out[..., :N]


# ---------------------------------------------------------------------------
# Kernel 2: fused abs(ifft2) + final `post` 1x1 conv (C -> C/2).
# Input y_ref: (2C, TN) = [re(ifft) ; im(ifft)]
# Input w_ref: (Co, C+1) packed  cols [0:C]=w_post, [C]=b_post
# ---------------------------------------------------------------------------
def _make_post_kernel(C, Co):
    def kernel(y_ref, w_ref, o_ref):
        y = y_ref[...]
        re = y[0:C, :]
        im = y[C:2 * C, :]
        mag = jnp.sqrt(re * re + im * im)          # abs(ifft2(.))
        wp = w_ref[...]
        w = wp[:, 0:C]
        b = wp[:, C:C + 1]
        o_ref[...] = (_mix(w, mag) + b).astype(o_ref.dtype)
    return kernel


def fu_post(y_b2cn, w_pack, C, *, target_cols=2048):
    B, C2, N = y_b2cn.shape
    assert C2 == 2 * C
    Co = w_pack.shape[0]
    bn, npad = _pick_block(N, B, target_cols)
    yp = _pad_last(y_b2cn, npad)

    out = pl.pallas_call(
        _make_post_kernel(C, Co),
        out_shape=jax.ShapeDtypeStruct((B, Co, npad), jnp.float32),
        grid_spec=pltpu.PrefetchScalarGridSpec(
            num_scalar_prefetch=0,
            grid=(B, npad // bn),
            in_specs=[pl.BlockSpec((None, C2, bn), lambda b, i: (b, 0, i)),
                      pl.BlockSpec(w_pack.shape, lambda b, i: (0, 0))],
            out_specs=pl.BlockSpec((None, Co, bn), lambda b, i: (b, 0, i)),
        ),
        compiler_params=pltpu.CompilerParams(
            dimension_semantics=("parallel", "parallel")),
    )(yp, w_pack)
    return out if npad == N else out[..., :N]


# ---------------------------------------------------------------------------
# Weight packing (tiny; one BlockSpec / DMA per kernel instead of 8-10)
# ---------------------------------------------------------------------------
def _pack_fuse_weights(p, C):
    amp = jnp.concatenate([p["wa1"], p["ba1"], p["wa2"], p["ba2"]], axis=1)
    pha = jnp.concatenate([p["wp1"], p["bp1"], p["wp2"], p["bp2"]], axis=1)
    return jnp.concatenate([amp, pha], axis=0).astype(jnp.float32)   # (2C, 2C+2)


def _pack_post_weights(p):
    return jnp.concatenate([p["w_post"], p["b_post"]], axis=1).astype(jnp.float32)


# ---------------------------------------------------------------------------
# Full forward (scale_factor == 2 path of FU)
# ---------------------------------------------------------------------------
def fu_forward(x_nchw, params):
    B, C, H, W = x_nchw.shape
    N = H * W

    # TODO(synk): fft2/ifft2 and complex tensor construction have no Pallas
    # TPU equivalent; they stay in XLA.
    fft_x = jnp.fft.fft2(x_nchw)

    use_atan2 = _atan2_in_kernel()
    if use_atan2:
        fuse_in = jnp.concatenate(
            [fft_x.real.astype(jnp.float32), fft_x.imag.astype(jnp.float32)],
            axis=1)                                   # (B, 2C, H, W) = [re; im]
    else:
        # Fallback: angle in XLA (kernel still fuses everything downstream).
        fuse_in = jnp.concatenate(
            [jnp.abs(fft_x).astype(jnp.float32),
             jnp.angle(fft_x).astype(jnp.float32)], axis=1)  # [mag; pha]
    fuse_in = fuse_in.reshape(B, 2 * C, N)            # natural lane-dense layout

    ri = fu_fuse(fuse_in, _pack_fuse_weights(params, C), C,
                 reim_input=use_atan2)                # (B, 2C, N) = [real; imag]
    ri = ri.reshape(B, 2 * C, H, W)
    real = ri[:, :C]
    imag = ri[:, C:]

    # tile(2,2) commutes with the elementwise reconstruction, so real/imag are
    # built at the original resolution and replicated afterwards.
    real_t = jnp.tile(real, (1, 1, 2, 2))
    imag_t = jnp.tile(imag, (1, 1, 2, 2))

    y = jnp.fft.ifft2(jax.lax.complex(real_t, imag_t))          # (B, C, 2H, 2W)
    y_ri = jnp.concatenate(
        [y.real.astype(jnp.float32), y.imag.astype(jnp.float32)], axis=1)
    y_ri = y_ri.reshape(B, 2 * C, 4 * N)

    o = fu_post(y_ri, _pack_post_weights(params), C)            # (B, C/2, 4N)
    return o.reshape(B, C // 2, 2 * H, 2 * W)


# ---------------------------------------------------------------------------
# Pure-JAX reference of the same math (mirrors the PyTorch forward).
# ---------------------------------------------------------------------------
def fu_reference(x, p):
    def conv1x1(t, w, b):
        return jnp.einsum("bihw,oi->bohw", t, w) + b.reshape(1, -1, 1, 1)

    leaky = lambda v: jnp.where(v > 0, v, 0.1 * v)

    fft_x = jnp.fft.fft2(x)
    mag = jnp.abs(fft_x)
    pha = jnp.angle(fft_x)
    Mag = conv1x1(leaky(conv1x1(mag, p["wa1"], p["ba1"])), p["wa2"], p["ba2"])
    Pha = conv1x1(leaky(conv1x1(pha, p["wp1"], p["bp1"])), p["wp2"], p["bp2"])
    amp_t = jnp.tile(Mag, (1, 1, 2, 2))
    pha_t = jnp.tile(Pha, (1, 1, 2, 2))
    out_c = jax.lax.complex(amp_t * jnp.cos(pha_t), amp_t * jnp.sin(pha_t))
    output = jnp.abs(jnp.fft.ifft2(out_c))
    return conv1x1(output, p["w_post"], p["b_post"])


def make_params(key, C):
    ks = jax.random.split(key, 10)
    n = lambda k, shape: jax.random.normal(k, shape, jnp.float32) * 0.1
    return {
        # PyTorch Conv2d 1x1 weight layout (out, in); biases stored (out, 1).
        "wa1": n(ks[0], (C, C)), "ba1": n(ks[1], (C, 1)),
        "wa2": n(ks[2], (C, C)), "ba2": n(ks[3], (C, 1)),
        "wp1": n(ks[4], (C, C)), "bp1": n(ks[5], (C, 1)),
        "wp2": n(ks[6], (C, C)), "bp2": n(ks[7], (C, 1)),
        "w_post": n(ks[8], (C // 2, C)), "b_post": n(ks[9], (C // 2, 1)),
    }


if __name__ == "__main__":
    B, C, H, W = 2, 4, 16, 16          # in_channels=4, scale_factor=2
    key = jax.random.PRNGKey(0)
    kx, kp = jax.random.split(key)
    x = jax.random.normal(kx, (B, C, H, W), jnp.float32)
    params = make_params(kp, C)

    _atan2_in_kernel()                 # warm the capability probe outside jit

    fwd = jax.jit(fu_forward)
    out = jax.block_until_ready(fwd(x, params))
    ref = jax.block_until_ready(fu_reference(x, params))

    assert out.shape == (B, C // 2, 2 * H, 2 * W), out.shape
    max_err = float(jnp.max(jnp.abs(out - ref)))
    assert jnp.allclose(out, ref, atol=1e-3, rtol=1e-3), max_err
    print("KERNEL_OK")
</pallas_src>

<mosaic_0001>
module attributes {stable_mosaic.version = 11 : i64} {
  func.func @kernel(%arg0: i32, %arg1: i32, %arg2: memref<1x8x256xf32, #tpu.memory_space<vmem>>, %arg3: memref<8x10xf32, #tpu.memory_space<vmem>>, %arg4: memref<1x8x256xf32, #tpu.memory_space<vmem>>) attributes {dimension_semantics = [#tpu.dimension_semantics<parallel>, #tpu.dimension_semantics<parallel>], iteration_bounds = array<i64: 2, 1>, scalar_prefetch = 0 : i64, scratch_operands = 0 : i64, tpu.core_type = #tpu.core_type<tc>, window_params = [{transform_indices = @transform_0, window_bounds = array<i64: 1, 8, 256>}, {pipeline_mode = #tpu.pipeline_mode<synchronous>, transform_indices = @transform_1, window_bounds = array<i64: 8, 10>}, {transform_indices = @transform_2, window_bounds = array<i64: 1, 8, 256>}]} {
    %c0 = arith.constant 0 : index
    %c0_0 = arith.constant 0 : index
    %c0_1 = arith.constant 0 : index
    %0 = vector.load %arg2[%c0, %c0_0, %c0_1] : memref<1x8x256xf32, #tpu.memory_space<vmem>>, vector<1x8x256xf32>
    %1 = vector.shape_cast %0 : vector<1x8x256xf32> to vector<8x256xf32>
    %c0_2 = arith.constant 0 : index
    %c0_3 = arith.constant 0 : index
    %2 = vector.load %arg3[%c0_2, %c0_3] : memref<8x10xf32, #tpu.memory_space<vmem>>, vector<8x10xf32>
    %3 = vector.extract_strided_slice %1 {offsets = [0, 0], sizes = [4, 256], strides = [1, 1]} : vector<8x256xf32> to vector<4x256xf32>
    %4 = vector.extract_strided_slice %1 {offsets = [4, 0], sizes = [4, 256], strides = [1, 1]} : vector<8x256xf32> to vector<4x256xf32>
    %5 = vector.extract_strided_slice %2 {offsets = [0, 0], sizes = [4, 4], strides = [1, 1]} : vector<8x10xf32> to vector<4x4xf32>
    %6 = vector.extract_strided_slice %2 {offsets = [0, 4], sizes = [4, 1], strides = [1, 1]} : vector<8x10xf32> to vector<4x1xf32>
    %7 = vector.extract_strided_slice %2 {offsets = [0, 5], sizes = [4, 4], strides = [1, 1]} : vector<8x10xf32> to vector<4x4xf32>
    %8 = vector.extract_strided_slice %2 {offsets = [0, 9], sizes = [4, 1], strides = [1, 1]} : vector<8x10xf32> to vector<4x1xf32>
    %9 = vector.extract_strided_slice %2 {offsets = [4, 0], sizes = [4, 4], strides = [1, 1]} : vector<8x10xf32> to vector<4x4xf32>
    %10 = vector.extract_strided_slice %2 {offsets = [4, 4], sizes = [4, 1], strides = [1, 1]} : vector<8x10xf32> to vector<4x1xf32>
    %11 = vector.extract_strided_slice %2 {offsets = [4, 5], sizes = [4, 4], strides = [1, 1]} : vector<8x10xf32> to vector<4x4xf32>
    %12 = vector.extract_strided_slice %2 {offsets = [4, 9], sizes = [4, 1], strides = [1, 1]} : vector<8x10xf32> to vector<4x1xf32>
    %13 = vector.extract_strided_slice %5 {offsets = [0, 0], sizes = [4, 1], strides = [1, 1]} : vector<4x4xf32> to vector<4x1xf32>
    %14 = vector.extract_strided_slice %3 {offsets = [0, 0], sizes = [1, 256], strides = [1, 1]} : vector<4x256xf32> to vector<1x256xf32>
    %15 = vector.broadcast %13 : vector<4x1xf32> to vector<4x256xf32>
    %16 = vector.broadcast %14 : vector<1x256xf32> to vector<4x256xf32>
    %17 = arith.mulf %15, %16 : vector<4x256xf32>
    %18 = vector.extract_strided_slice %5 {offsets = [0, 1], sizes = [4, 1], strides = [1, 1]} : vector<4x4xf32> to vector<4x1xf32>
    %19 = vector.extract_strided_slice %3 {offsets = [1, 0], sizes = [1, 256], strides = [1, 1]} : vector<4x256xf32> to vector<1x256xf32>
    %20 = vector.broadcast %18 : vector<4x1xf32> to vector<4x256xf32>
    %21 = vector.broadcast %19 : vector<1x256xf32> to vector<4x256xf32>
    %22 = arith.mulf %20, %21 : vector<4x256xf32>
    %23 = arith.addf %17, %22 : vector<4x256xf32>
    %24 = vector.extract_strided_slice %5 {offsets = [0, 2], sizes = [4, 1], strides = [1, 1]} : vector<4x4xf32> to vector<4x1xf32>
    %25 = vector.extract_strided_slice %3 {offsets = [2, 0], sizes = [1, 256], strides = [1, 1]} : vector<4x256xf32> to vector<1x256xf32>
    %26 = vector.broadcast %24 : vector<4x1xf32> to vector<4x256xf32>
    %27 = vector.broadcast %25 : vector<1x256xf32> to vector<4x256xf32>
    %28 = arith.mulf %26, %27 : vector<4x256xf32>
    %29 = arith.addf %23, %28 : vector<4x256xf32>
    %30 = vector.extract_strided_slice %5 {offsets = [0, 3], sizes = [4, 1], strides = [1, 1]} : vector<4x4xf32> to vector<4x1xf32>
    %31 = vector.extract_strided_slice %3 {offsets = [3, 0], sizes = [1, 256], strides = [1, 1]} : vector<4x256xf32> to vector<1x256xf32>
    %32 = vector.broadcast %30 : vector<4x1xf32> to vector<4x256xf32>
    %33 = vector.broadcast %31 : vector<1x256xf32> to vector<4x256xf32>
    %34 = arith.mulf %32, %33 : vector<4x256xf32>
    %35 = arith.addf %29, %34 : vector<4x256xf32>
    %36 = vector.broadcast %6 : vector<4x1xf32> to vector<4x256xf32>
    %37 = arith.addf %35, %36 : vector<4x256xf32>
    %cst = arith.constant 0.000000e+00 : f32
    %38 = vector.broadcast %cst : f32 to vector<4x256xf32>
    %39 = arith.cmpf ogt, %37, %38 : vector<4x256xf32>
    %cst_4 = arith.constant 1.000000e-01 : f32
    %40 = vector.broadcast %cst_4 : f32 to vector<4x256xf32>
    %41 = arith.mulf %40, %37 : vector<4x256xf32>
    %42 = arith.select %39, %37, %41 : vector<4x256xi1>, vector<4x256xf32>
    %43 = vector.extract_strided_slice %7 {offsets = [0, 0], sizes = [4, 1], strides = [1, 1]} : vector<4x4xf32> to vector<4x1xf32>
    %44 = vector.extract_strided_slice %42 {offsets = [0, 0], sizes = [1, 256], strides = [1, 1]} : vector<4x256xf32> to vector<1x256xf32>
    %45 = vector.broadcast %43 : vector<4x1xf32> to vector<4x256xf32>
    %46 = vector.broadcast %44 : vector<1x256xf32> to vector<4x256xf32>
    %47 = arith.mulf %45, %46 : vector<4x256xf32>
    %48 = vector.extract_strided_slice %7 {offsets = [0, 1], sizes = [4, 1], strides = [1, 1]} : vector<4x4xf32> to vector<4x1xf32>
    %49 = vector.extract_strided_slice %42 {offsets = [1, 0], sizes = [1, 256], strides = [1, 1]} : vector<4x256xf32> to vector<1x256xf32>
    %50 = vector.broadcast %48 : vector<4x1xf32> to vector<4x256xf32>
    %51 = vector.broadcast %49 : vector<1x256xf32> to vector<4x256xf32>
    %52 = arith.mulf %50, %51 : vector<4x256xf32>
    %53 = arith.addf %47, %52 : vector<4x256xf32>
    %54 = vector.extract_strided_slice %7 {offsets = [0, 2], sizes = [4, 1], strides = [1, 1]} : vector<4x4xf32> to vector<4x1xf32>
    %55 = vector.extract_strided_slice %42 {offsets = [2, 0], sizes = [1, 256], strides = [1, 1]} : vector<4x256xf32> to vector<1x256xf32>
    %56 = vector.broadcast %54 : vector<4x1xf32> to vector<4x256xf32>
    %57 = vector.broadcast %55 : vector<1x256xf32> to vector<4x256xf32>
    %58 = arith.mulf %56, %57 : vector<4x256xf32>
    %59 = arith.addf %53, %58 : vector<4x256xf32>
    %60 = vector.extract_strided_slice %7 {offsets = [0, 3], sizes = [4, 1], strides = [1, 1]} : vector<4x4xf32> to vector<4x1xf32>
    %61 = vector.extract_strided_slice %42 {offsets = [3, 0], sizes = [1, 256], strides = [1, 1]} : vector<4x256xf32> to vector<1x256xf32>
    %62 = vector.broadcast %60 : vector<4x1xf32> to vector<4x256xf32>
    %63 = vector.broadcast %61 : vector<1x256xf32> to vector<4x256xf32>
    %64 = arith.mulf %62, %63 : vector<4x256xf32>
    %65 = arith.addf %59, %64 : vector<4x256xf32>
    %66 = vector.broadcast %8 : vector<4x1xf32> to vector<4x256xf32>
    %67 = arith.addf %65, %66 : vector<4x256xf32>
    %68 = vector.extract_strided_slice %9 {offsets = [0, 0], sizes = [4, 1], strides = [1, 1]} : vector<4x4xf32> to vector<4x1xf32>
    %69 = vector.extract_strided_slice %4 {offsets = [0, 0], sizes = [1, 256], strides = [1, 1]} : vector<4x256xf32> to vector<1x256xf32>
    %70 = vector.broadcast %68 : vector<4x1xf32> to vector<4x256xf32>
    %71 = vector.broadcast %69 : vector<1x256xf32> to vector<4x256xf32>
    %72 = arith.mulf %70, %71 : vector<4x256xf32>
    %73 = vector.extract_strided_slice %9 {offsets = [0, 1], sizes = [4, 1], strides = [1, 1]} : vector<4x4xf32> to vector<4x1xf32>
    %74 = vector.extract_strided_slice %4 {offsets = [1, 0], sizes = [1, 256], strides = [1, 1]} : vector<4x256xf32> to vector<1x256xf32>
    %75 = vector.broadcast %73 : vector<4x1xf32> to vector<4x256xf32>
    %76 = vector.broadcast %74 : vector<1x256xf32> to vector<4x256xf32>
    %77 = arith.mulf %75, %76 : vector<4x256xf32>
    %78 = arith.addf %72, %77 : vector<4x256xf32>
    %79 = vector.extract_strided_slice %9 {offsets = [0, 2], sizes = [4, 1], strides = [1, 1]} : vector<4x4xf32> to vector<4x1xf32>
    %80 = vector.extract_strided_slice %4 {offsets = [2, 0], sizes = [1, 256], strides = [1, 1]} : vector<4x256xf32> to vector<1x256xf32>
    %81 = vector.broadcast %79 : vector<4x1xf32> to vector<4x256xf32>
    %82 = vector.broadcast %80 : vector<1x256xf32> to vector<4x256xf32>
    %83 = arith.mulf %81, %82 : vector<4x256xf32>
    %84 = arith.addf %78, %83 : vector<4x256xf32>
    %85 = vector.extract_strided_slice %9 {offsets = [0, 3], sizes = [4, 1], strides = [1, 1]} : vector<4x4xf32> to vector<4x1xf32>
    %86 = vector.extract_strided_slice %4 {offsets = [3, 0], sizes = [1, 256], strides = [1, 1]} : vector<4x256xf32> to vector<1x256xf32>
    %87 = vector.broadcast %85 : vector<4x1xf32> to vector<4x256xf32>
    %88 = vector.broadcast %86 : vector<1x256xf32> to vector<4x256xf32>
    %89 = arith.mulf %87, %88 : vector<4x256xf32>
    %90 = arith.addf %84, %89 : vector<4x256xf32>
    %91 = vector.broadcast %10 : vector<4x1xf32> to vector<4x256xf32>
    %92 = arith.addf %90, %91 : vector<4x256xf32>
    %cst_5 = arith.constant 0.000000e+00 : f32
    %93 = vector.broadcast %cst_5 : f32 to vector<4x256xf32>
    %94 = arith.cmpf ogt, %92, %93 : vector<4x256xf32>
    %cst_6 = arith.constant 1.000000e-01 : f32
    %95 = vector.broadcast %cst_6 : f32 to vector<4x256xf32>
    %96 = arith.mulf %95, %92 : vector<4x256xf32>
    %97 = arith.select %94, %92, %96 : vector<4x256xi1>, vector<4x256xf32>
    %98 = vector.extract_strided_slice %11 {offsets = [0, 0], sizes = [4, 1], strides = [1, 1]} : vector<4x4xf32> to vector<4x1xf32>
    %99 = vector.extract_strided_slice %97 {offsets = [0, 0], sizes = [1, 256], strides = [1, 1]} : vector<4x256xf32> to vector<1x256xf32>
    %100 = vector.broadcast %98 : vector<4x1xf32> to vector<4x256xf32>
    %101 = vector.broadcast %99 : vector<1x256xf32> to vector<4x256xf32>
    %102 = arith.mulf %100, %101 : vector<4x256xf32>
    %103 = vector.extract_strided_slice %11 {offsets = [0, 1], sizes = [4, 1], strides = [1, 1]} : vector<4x4xf32> to vector<4x1xf32>
    %104 = vector.extract_strided_slice %97 {offsets = [1, 0], sizes = [1, 256], strides = [1, 1]} : vector<4x256xf32> to vector<1x256xf32>
    %105 = vector.broadcast %103 : vector<4x1xf32> to vector<4x256xf32>
    %106 = vector.broadcast %104 : vector<1x256xf32> to vector<4x256xf32>
    %107 = arith.mulf %105, %106 : vector<4x256xf32>
    %108 = arith.addf %102, %107 : vector<4x256xf32>
    %109 = vector.extract_strided_slice %11 {offsets = [0, 2], sizes = [4, 1], strides = [1, 1]} : vector<4x4xf32> to vector<4x1xf32>
    %110 = vector.extract_strided_slice %97 {offsets = [2, 0], sizes = [1, 256], strides = [1, 1]} : vector<4x256xf32> to vector<1x256xf32>
    %111 = vector.broadcast %109 : vector<4x1xf32> to vector<4x256xf32>
    %112 = vector.broadcast %110 : vector<1x256xf32> to vector<4x256xf32>
    %113 = arith.mulf %111, %112 : vector<4x256xf32>
    %114 = arith.addf %108, %113 : vector<4x256xf32>
    %115 = vector.extract_strided_slice %11 {offsets = [0, 3], sizes = [4, 1], strides = [1, 1]} : vector<4x4xf32> to vector<4x1xf32>
    %116 = vector.extract_strided_slice %97 {offsets = [3, 0], sizes = [1, 256], strides = [1, 1]} : vector<4x256xf32> to vector<1x256xf32>
    %117 = vector.broadcast %115 : vector<4x1xf32> to vector<4x256xf32>
    %118 = vector.broadcast %116 : vector<1x256xf32> to vector<4x256xf32>
    %119 = arith.mulf %117, %118 : vector<4x256xf32>
    %120 = arith.addf %114, %119 : vector<4x256xf32>
    %121 = vector.broadcast %12 : vector<4x1xf32> to vector<4x256xf32>
    %122 = arith.addf %120, %121 : vector<4x256xf32>
    %123 = math.cos %122 : vector<4x256xf32>
    %124 = arith.mulf %67, %123 : vector<4x256xf32>
    %125 = math.sin %122 : vector<4x256xf32>
    %126 = arith.mulf %67, %125 : vector<4x256xf32>
    %127 = tpu.concatenate %124, %126 in 0 : vector<4x256xf32>, vector<4x256xf32> -> vector<8x256xf32>
    %c0_7 = arith.constant 0 : index
    %c0_8 = arith.constant 0 : index
    %c0_9 = arith.constant 0 : index
    %128 = vector.load %arg4[%c0_7, %c0_8, %c0_9] : memref<1x8x256xf32, #tpu.memory_space<vmem>>, vector<1x8x256xf32>
    %129 = vector.shape_cast %128 : vector<1x8x256xf32> to vector<8x256xf32>
    %130 = vector.shape_cast %127 : vector<8x256xf32> to vector<1x8x256xf32>
    tpu.vector_store %arg4[%c0_7, %c0_8, %c0_9], %130 {strides = array<i32>} : memref<1x8x256xf32, #tpu.memory_space<vmem>>, vector<1x8x256xf32>,
    return
  }
  func.func @transform_0(%arg0: i32, %arg1: i32) -> (i32, i32, i32) {
    %c0_i32 = arith.constant 0 : i32
    %c0_i32_0 = arith.constant 0 : i32
    return %arg0, %c0_i32, %arg1 : i32, i32, i32
  }
  func.func @transform_1(%arg0: i32, %arg1: i32) -> (i32, i32) {
    %c0_i32 = arith.constant 0 : i32
    %c0_i32_0 = arith.constant 0 : i32
    %c0_i32_1 = arith.constant 0 : i32
    return %c0_i32, %c0_i32_0 : i32, i32
  }
  func.func @transform_2(%arg0: i32, %arg1: i32) -> (i32, i32, i32) {
    %c0_i32 = arith.constant 0 : i32
    %c0_i32_0 = arith.constant 0 : i32
    return %arg0, %c0_i32, %arg1 : i32, i32, i32
  }
}

module attributes {stable_mosaic.version = 11 : i64} {
  func.func @kernel(%arg0: i32, %arg1: i32, %arg2: memref<1x8x1024xf32, #tpu.memory_space<vmem>>, %arg3: memref<2x5xf32, #tpu.memory_space<vmem>>, %arg4: memref<1x2x1024xf32, #tpu.memory_space<vmem>>) attributes {dimension_semantics = [#tpu.dimension_semantics<parallel>, #tpu.dimension_semantics<parallel>], iteration_bounds = array<i64: 2, 1>, scalar_prefetch = 0 : i64, scratch_operands = 0 : i64, tpu.core_type = #tpu.core_type<tc>, window_params = [{transform_indices = @transform_0, window_bounds = array<i64: 1, 8, 1024>}, {pipeline_mode = #tpu.pipeline_mode<synchronous>, transform_indices = @transform_1, window_bounds = array<i64: 2, 5>}, {transform_indices = @transform_2, window_bounds = array<i64: 1, 2, 1024>}]} {
    %c0 = arith.constant 0 : index
    %c0_0 = arith.constant 0 : index
    %c0_1 = arith.constant 0 : index
    %0 = vector.load %arg2[%c0, %c0_0, %c0_1] : memref<1x8x1024xf32, #tpu.memory_space<vmem>>, vector<1x8x1024xf32>
    %1 = vector.shape_cast %0 : vector<1x8x1024xf32> to vector<8x1024xf32>
    %2 = vector.extract_strided_slice %1 {offsets = [0, 0], sizes = [4, 1024], strides = [1, 1]} : vector<8x1024xf32> to vector<4x1024xf32>
    %3 = vector.extract_strided_slice %1 {offsets = [4, 0], sizes = [4, 1024], strides = [1, 1]} : vector<8x1024xf32> to vector<4x1024xf32>
    %4 = arith.mulf %2, %2 : vector<4x1024xf32>
    %5 = arith.mulf %3, %3 : vector<4x1024xf32>
    %6 = arith.addf %4, %5 : vector<4x1024xf32>
    %7 = math.sqrt %6 : vector<4x1024xf32>
    %c0_2 = arith.constant 0 : index
    %c0_3 = arith.constant 0 : index
    %8 = vector.load %arg3[%c0_2, %c0_3] : memref<2x5xf32, #tpu.memory_space<vmem>>, vector<2x5xf32>
    %9 = vector.extract_strided_slice %8 {offsets = [0, 0], sizes = [2, 4], strides = [1, 1]} : vector<2x5xf32> to vector<2x4xf32>
    %10 = vector.extract_strided_slice %8 {offsets = [0, 4], sizes = [2, 1], strides = [1, 1]} : vector<2x5xf32> to vector<2x1xf32>
    %11 = vector.extract_strided_slice %9 {offsets = [0, 0], sizes = [2, 1], strides = [1, 1]} : vector<2x4xf32> to vector<2x1xf32>
    %12 = vector.extract_strided_slice %7 {offsets = [0, 0], sizes = [1, 1024], strides = [1, 1]} : vector<4x1024xf32> to vector<1x1024xf32>
    %13 = vector.broadcast %11 : vector<2x1xf32> to vector<2x1024xf32>
    %14 = vector.broadcast %12 : vector<1x1024xf32> to vector<2x1024xf32>
    %15 = arith.mulf %13, %14 : vector<2x1024xf32>
    %16 = vector.extract_strided_slice %9 {offsets = [0, 1], sizes = [2, 1], strides = [1, 1]} : vector<2x4xf32> to vector<2x1xf32>
    %17 = vector.extract_strided_slice %7 {offsets = [1, 0], sizes = [1, 1024], strides = [1, 1]} : vector<4x1024xf32> to vector<1x1024xf32>
    %18 = vector.broadcast %16 : vector<2x1xf32> to vector<2x1024xf32>
    %19 = vector.broadcast %17 : vector<1x1024xf32> to vector<2x1024xf32>
    %20 = arith.mulf %18, %19 : vector<2x1024xf32>
    %21 = arith.addf %15, %20 : vector<2x1024xf32>
    %22 = vector.extract_strided_slice %9 {offsets = [0, 2], sizes = [2, 1], strides = [1, 1]} : vector<2x4xf32> to vector<2x1xf32>
    %23 = vector.extract_strided_slice %7 {offsets = [2, 0], sizes = [1, 1024], strides = [1, 1]} : vector<4x1024xf32> to vector<1x1024xf32>
    %24 = vector.broadcast %22 : vector<2x1xf32> to vector<2x1024xf32>
    %25 = vector.broadcast %23 : vector<1x1024xf32> to vector<2x1024xf32>
    %26 = arith.mulf %24, %25 : vector<2x1024xf32>
    %27 = arith.addf %21, %26 : vector<2x1024xf32>
    %28 = vector.extract_strided_slice %9 {offsets = [0, 3], sizes = [2, 1], strides = [1, 1]} : vector<2x4xf32> to vector<2x1xf32>
    %29 = vector.extract_strided_slice %7 {offsets = [3, 0], sizes = [1, 1024], strides = [1, 1]} : vector<4x1024xf32> to vector<1x1024xf32>
    %30 = vector.broadcast %28 : vector<2x1xf32> to vector<2x1024xf32>
    %31 = vector.broadcast %29 : vector<1x1024xf32> to vector<2x1024xf32>
    %32 = arith.mulf %30, %31 : vector<2x1024xf32>
    %33 = arith.addf %27, %32 : vector<2x1024xf32>
    %34 = vector.broadcast %10 : vector<2x1xf32> to vector<2x1024xf32>
    %35 = arith.addf %33, %34 : vector<2x1024xf32>
    %c0_4 = arith.constant 0 : index
    %c0_5 = arith.constant 0 : index
    %c0_6 = arith.constant 0 : index
    %36 = vector.load %arg4[%c0_4, %c0_5, %c0_6] : memref<1x2x1024xf32, #tpu.memory_space<vmem>>, vector<1x2x1024xf32>
    %37 = vector.shape_cast %36 : vector<1x2x1024xf32> to vector<2x1024xf32>
    %38 = vector.shape_cast %35 : vector<2x1024xf32> to vector<1x2x1024xf32>
    tpu.vector_store %arg4[%c0_4, %c0_5, %c0_6], %38 {strides = array<i32>} : memref<1x2x1024xf32, #tpu.memory_space<vmem>>, vector<1x2x1024xf32>,
    return
  }
  func.func @transform_0(%arg0: i32, %arg1: i32) -> (i32, i32, i32) {
    %c0_i32 = arith.constant 0 : i32
    %c0_i32_0 = arith.constant 0 : i32
    return %arg0, %c0_i32, %arg1 : i32, i32, i32
  }
  func.func @transform_1(%arg0: i32, %arg1: i32) -> (i32, i32) {
    %c0_i32 = arith.constant 0 : i32
    %c0_i32_0 = arith.constant 0 : i32
    %c0_i32_1 = arith.constant 0 : i32
    return %c0_i32, %c0_i32_0 : i32, i32
  }
  func.func @transform_2(%arg0: i32, %arg1: i32) -> (i32, i32, i32) {
    %c0_i32 = arith.constant 0 : i32
    %c0_i32_0 = arith.constant 0 : i32
    return %arg0, %c0_i32, %arg1 : i32, i32, i32
  }
}

</mosaic_0001>

<bundles_post_ra>
// kernel: tile.14
= control target key start
LH: loop header
LB: loop body
LE: loop exit
PB: predicated region body
PF: predicated region fallthrough
CT: control target
= control target key end

     0   :  { %vm1282_vm0 = vcmask 1047556   ;;  %s2488_s10 = smov 16   ;;  %vm1284_vm1 = vcmask 130048   ;;  %vm1573_vm2 = vcmask 261248   ;;  %s3619_s0 = inlined_call_operand.vmem [shape: f32[2,4,2,16,2,16], index: 0, kind: input, shape index: {}]   ;;  %s3620_s1 = inlined_call_operand.vmem [shape: f32[2,4,32,32], index: 1, kind: output, shape index: {}]  }
   0x1   :  { %v2418_v0 = vld [vmem:[%s3619_s0 + $0xe] sm:$0x3]  ;;  %v2419_v1 = vld [vmem:[%s3619_s0 + $0xc] sm:$0x3]  ;;  %v2420_v2 = vld [vmem:[%s3619_s0 + $0xa] sm:$0x3] }
   0x2   :  { %1248 = vst [vmem:[#allocation0 + $0x38] sm:$0x3] %v2418_v0  ;;  %1253 = vst [vmem:[#allocation0 + $0x30] sm:$0x3] %v2419_v1  ;;  %v2421_v3 = vld [vmem:[%s3619_s0 + $0x8] sm:$0x3] }
   0x3   :  { %1258 = vst [vmem:[#allocation0 + $0x28] sm:$0x3] %v2420_v2  ;;  %v2422_v4 = vld [vmem:[%s3619_s0 + $0x6] sm:$0x3]  ;;  %v2423_v5 = vld [vmem:[%s3619_s0 + $0x4] sm:$0x3] }
   0x4   :  { %1263 = vst [vmem:[#allocation0 + $0x20] sm:$0x3] %v2421_v3  ;;  %1268 = vst [vmem:[#allocation0 + $0x18] sm:$0x3] %v2422_v4  ;;  %v2424_v6 = vld [vmem:[%s3619_s0 + $0x2] sm:$0x3] }
   0x5   :  { %1273 = vst [vmem:[#allocation0 + $0x10] sm:$0x3] %v2423_v5  ;;  %v1278_v7 = vld [vmem:[%s3619_s0] sm:$0x3]  ;;  %1277 = vst [vmem:[#allocation0 + $0x8] sm:$0x3] %v2424_v6 }
   0x6   :  { %1279 = vst [vmem:[#allocation0] sm:$0x3] %v1278_v7  ;;  %v2354_v8 = vld [vmem:[%s3619_s0 + $0x8e] sm:$0x3]  ;;  %v2355_v9 = vld [vmem:[%s3619_s0 + $0x8c] sm:$0x3] }
   0x7   :  { %v2356_v10 = vld [vmem:[%s3619_s0 + $0x8a] sm:$0x3]  ;;  %928 = vst [vmem:[#allocation0 + $0x238] sm:$0x3] %v2354_v8  ;;  %933 = vst [vmem:[#allocation0 + $0x230] sm:$0x3] %v2355_v9 }
   0x8   :  { %938 = vst [vmem:[#allocation0 + $0x228] sm:$0x3] %v2356_v10  ;;  %v2357_v11 = vld [vmem:[%s3619_s0 + $0x88] sm:$0x3]  ;;  %v2358_v12 = vld [vmem:[%s3619_s0 + $0x86] sm:$0x3] }
   0x9   :  { %v2359_v13 = vld [vmem:[%s3619_s0 + $0x84] sm:$0x3]  ;;  %943 = vst [vmem:[#allocation0 + $0x220] sm:$0x3] %v2357_v11  ;;  %948 = vst [vmem:[#allocation0 + $0x218] sm:$0x3] %v2358_v12 }
   0xa   :  { %953 = vst [vmem:[#allocation0 + $0x210] sm:$0x3] %v2359_v13  ;;  %v2360_v14 = vld [vmem:[%s3619_s0 + $0x82] sm:$0x3]  ;;  %v2361_v15 = vld [vmem:[%s3619_s0 + $0x80] sm:$0x3] }
   0xb   :  { %v2386_v16 = vld [vmem:[%s3619_s0 + $0x4e] sm:$0x3]  ;;  %958 = vst [vmem:[#allocation0 + $0x208] sm:$0x3] %v2360_v14  ;;  %963 = vst [vmem:[#allocation0 + $0x200] sm:$0x3] %v2361_v15 }
   0xc   :  { %1088 = vst [vmem:[#allocation0 + $0x138] sm:$0x3] %v2386_v16  ;;  %v2387_v17 = vld [vmem:[%s3619_s0 + $0x4c] sm:$0x3]  ;;  %v2388_v18 = vld [vmem:[%s3619_s0 + $0x4a] sm:$0x3] }
   0xd   :  { %v2389_v19 = vld [vmem:[%s3619_s0 + $0x48] sm:$0x3]  ;;  %1093 = vst [vmem:[#allocation0 + $0x130] sm:$0x3] %v2387_v17  ;;  %1098 = vst [vmem:[#allocation0 + $0x128] sm:$0x3] %v2388_v18 }
   0xe   :  { %1103 = vst [vmem:[#allocation0 + $0x120] sm:$0x3] %v2389_v19  ;;  %v2390_v20 = vld [vmem:[%s3619_s0 + $0x46] sm:$0x3]  ;;  %v2391_v21 = vld [vmem:[%s3619_s0 + $0x44] sm:$0x3] }
   0xf   :  { %v2392_v22 = vld [vmem:[%s3619_s0 + $0x42] sm:$0x3]  ;;  %1108 = vst [vmem:[#allocation0 + $0x118] sm:$0x3] %v2390_v20  ;;  %1113 = vst [vmem:[#allocation0 + $0x110] sm:$0x3] %v2391_v21 }
  0x10   :  { %1118 = vst [vmem:[#allocation0 + $0x108] sm:$0x3] %v2392_v22  ;;  %v2393_v23 = vld [vmem:[%s3619_s0 + $0x40] sm:$0x3]  ;;  %v2322_v24 = vld [vmem:[%s3619_s0 + $0xce] sm:$0x3] }
  0x11   :  { %v2323_v25 = vld [vmem:[%s3619_s0 + $0xcc] sm:$0x3]  ;;  %v1568_v26 = vld [vmem:[#allocation0 + $0x1] ss:$8 sm:$0xf0]  }
  0x12   :  { %1123 = vst [vmem:[#allocation0 + $0x100] sm:$0x3] %v2393_v23  ;;  %768 = vst [vmem:[#allocation0 + $0x338] sm:$0x3] %v2322_v24  ;;  %v2324_v27 = vld [vmem:[%s3619_s0 + $0xca] sm:$0x3] }
  0x13   :  { %773 = vst [vmem:[#allocation0 + $0x330] sm:$0x3] %v2323_v25  ;;  %v1566_v28 = vld [vmem:[#allocation0 + $0x1] ss:$8 sm:$0xf]  }
  0x14   :  { %778 = vst [vmem:[#allocation0 + $0x328] sm:$0x3] %v2324_v27  ;;  %v2325_v29 = vld [vmem:[%s3619_s0 + $0xc8] sm:$0x3]  ;;  %v1570_v30 = vsel %vm1282_vm0, %v1568_v26, %v1566_v28  ;;  %v2326_v31 = vld [vmem:[%s3619_s0 + $0xc6] sm:$0x3] }
  0x15   :  { %783 = vst [vmem:[#allocation0 + $0x320] sm:$0x3] %v2325_v29  ;;  %v2327_v32 = vld [vmem:[%s3619_s0 + $0xc4] sm:$0x3]  ;;  %v2328_v33 = vld [vmem:[%s3619_s0 + $0xc2] sm:$0x3]  ;;  %1571 = vrot.lane.b32.xlu0 %v1570_v30, %s2488_s10 }
  0x16   :  { %v1589_v34 = vld [vmem:[#allocation0 + $0x201] ss:$8 sm:$0xf0]   ;;  %788 = vst [vmem:[#allocation0 + $0x318] sm:$0x3] %v2326_v31 }
  0x17   :  { %793 = vst [vmem:[#allocation0 + $0x310] sm:$0x3] %v2327_v32  ;;  %798 = vst [vmem:[#allocation0 + $0x308] sm:$0x3] %v2328_v33  ;;  %v2329_v35 = vld [vmem:[%s3619_s0 + $0xc0] sm:$0x3] }
  0x18   :  { %v1587_v36 = vld [vmem:[#allocation0 + $0x201] ss:$8 sm:$0xf]   ;;  %803 = vst [vmem:[#allocation0 + $0x300] sm:$0x3] %v2329_v35 }
  0x19   :  { %v2290_v37 = vld [vmem:[%s3619_s0 + $0x10e] sm:$0x3]  ;;  %v1591_v38 = vsel %vm1282_vm0, %v1589_v34, %v1587_v36  ;;  %v1578_v39 = vld [vmem:[#allocation0 + $0x101] ss:$8 sm:$0xf0]  }
  0x1a   :  { %608 = vst [vmem:[#allocation0 + $0x438] sm:$0x3] %v2290_v37  ;;  %v2291_v40 = vld [vmem:[%s3619_s0 + $0x10c] sm:$0x3]  ;;  %1592 = vrot.lane.b32.xlu1 %v1591_v38, %s2488_s10  ;;  %v2292_v41 = vld [vmem:[%s3619_s0 + $0x10a] sm:$0x3] }
  0x1b   :  { %613 = vst [vmem:[#allocation0 + $0x430] sm:$0x3] %v2291_v40  ;;  %v2293_v42 = vld [vmem:[%s3619_s0 + $0x108] sm:$0x3]  ;;  %v2294_v43 = vld [vmem:[%s3619_s0 + $0x106] sm:$0x3] }
  0x1c   :  { %v1576_v44 = vld [vmem:[#allocation0 + $0x101] ss:$8 sm:$0xf]   ;;  %618 = vst [vmem:[#allocation0 + $0x428] sm:$0x3] %v2292_v41 }
  0x1d   :  { %623 = vst [vmem:[#allocation0 + $0x420] sm:$0x3] %v2293_v42  ;;  %628 = vst [vmem:[#allocation0 + $0x418] sm:$0x3] %v2294_v43  ;;  %v2295_v45 = vld [vmem:[%s3619_s0 + $0x104] sm:$0x3]  ;;  %v1580_v46 = vsel %vm1282_vm0, %v1578_v39, %v1576_v44 }
  0x1e   :  { %633 = vst [vmem:[#allocation0 + $0x410] sm:$0x3] %v2295_v45  ;;  %v2296_v47 = vld [vmem:[%s3619_s0 + $0x102] sm:$0x3]  ;;  %v2297_v48 = vld [vmem:[%s3619_s0 + $0x100] sm:$0x3]  ;;  %1581 = vrot.lane.b32.xlu0 %v1580_v46, %s2488_s10 }
  0x1f   :  { %v2258_v49 = vld [vmem:[%s3619_s0 + $0x14e] sm:$0x3]  ;;  %v1600_v50 = vld [vmem:[#allocation0 + $0x301] ss:$8 sm:$0xf0]  }
  0x20   :  { %638 = vst [vmem:[#allocation0 + $0x408] sm:$0x3] %v2296_v47  ;;  %643 = vst [vmem:[#allocation0 + $0x400] sm:$0x3] %v2297_v48  ;;  %v2259_v51 = vld [vmem:[%s3619_s0 + $0x14c] sm:$0x3] }
  0x21   :  { %448 = vst [vmem:[#allocation0 + $0x538] sm:$0x3] %v2258_v49  ;;  %453 = vst [vmem:[#allocation0 + $0x530] sm:$0x3] %v2259_v51  ;;  %v2260_v52 = vld [vmem:[%s3619_s0 + $0x14a] sm:$0x3] }
  0x22   :  { %v2261_v53 = vld [vmem:[%s3619_s0 + $0x148] sm:$0x3]  ;;  %v2262_v54 = vld [vmem:[%s3619_s0 + $0x146] sm:$0x3]  ;;  %458 = vst [vmem:[#allocation0 + $0x528] sm:$0x3] %v2260_v52 }
  0x23   :  { %v1598_v55 = vld [vmem:[#allocation0 + $0x301] ss:$8 sm:$0xf]   ;;  %463 = vst [vmem:[#allocation0 + $0x520] sm:$0x3] %v2261_v53 }
  0x24   :  { %468 = vst [vmem:[#allocation0 + $0x518] sm:$0x3] %v2262_v54  ;;  %v2263_v56 = vld [vmem:[%s3619_s0 + $0x144] sm:$0x3]  ;;  %v1602_v57 = vsel %vm1282_vm0, %v1600_v50, %v1598_v55  ;;  %v2264_v58 = vld [vmem:[%s3619_s0 + $0x142] sm:$0x3] }
  0x25   :  { %473 = vst [vmem:[#allocation0 + $0x510] sm:$0x3] %v2263_v56  ;;  %v2265_v59 = vld [vmem:[%s3619_s0 + $0x140] sm:$0x3]  ;;  %v2226_v60 = vld [vmem:[%s3619_s0 + $0x18e] sm:$0x3]  ;;  %1603 = vrot.lane.b32.xlu1 %v1602_v57, %s2488_s10 }
  0x26   :  { %478 = vst [vmem:[#allocation0 + $0x508] sm:$0x3] %v2264_v58  ;;  %483 = vst [vmem:[#allocation0 + $0x500] sm:$0x3] %v2265_v59  ;;  %v2227_v61 = vld [vmem:[%s3619_s0 + $0x18c] sm:$0x3] }
  0x27   :  { %288 = vst [vmem:[#allocation0 + $0x638] sm:$0x3] %v2226_v60  ;;  %v2228_v62 = vld [vmem:[%s3619_s0 + $0x18a] sm:$0x3]  ;;  %v2229_v63 = vld [vmem:[%s3619_s0 + $0x188] sm:$0x3] }
  0x28   :  { %v1611_v0 = vld [vmem:[#allocation0 + $0x401] ss:$8 sm:$0xf0]   ;;  %293 = vst [vmem:[#allocation0 + $0x630] sm:$0x3] %v2227_v61 }
  0x29   :  { %298 = vst [vmem:[#allocation0 + $0x628] sm:$0x3] %v2228_v62  ;;  %303 = vst [vmem:[#allocation0 + $0x620] sm:$0x3] %v2229_v63  ;;  %v2230_v1 = vld [vmem:[%s3619_s0 + $0x186] sm:$0x3] }
  0x2a   :  { %308 = vst [vmem:[#allocation0 + $0x618] sm:$0x3] %v2230_v1  ;;  %v2231_v2 = vld [vmem:[%s3619_s0 + $0x184] sm:$0x3]  ;;  %v2232_v3 = vld [vmem:[%s3619_s0 + $0x182] sm:$0x3] }
  0x2b   :  { %v2233_v4 = vld [vmem:[%s3619_s0 + $0x180] sm:$0x3]  ;;  %313 = vst [vmem:[#allocation0 + $0x610] sm:$0x3] %v2231_v2  ;;  %318 = vst [vmem:[#allocation0 + $0x608] sm:$0x3] %v2232_v3 }
  0x2c   :  { %v1609_v5 = vld [vmem:[#allocation0 + $0x401] ss:$8 sm:$0xf]   ;;  %323 = vst [vmem:[#allocation0 + $0x600] sm:$0x3] %v2233_v4 }
  0x2d   :  { %v2194_v6 = vld [vmem:[%s3619_s0 + $0x1ce] sm:$0x3]  ;;  %v1613_v7 = vsel %vm1282_vm0, %v1611_v0, %v1609_v5  ;;  %v2195_v8 = vld [vmem:[%s3619_s0 + $0x1cc] sm:$0x3]  ;;  %v2196_v9 = vld [vmem:[%s3619_s0 + $0x1ca] sm:$0x3] }
  0x2e   :  { %128 = vst [vmem:[#allocation0 + $0x738] sm:$0x3] %v2194_v6  ;;  %v2197_v10 = vld [vmem:[%s3619_s0 + $0x1c8] sm:$0x3]  ;;  %1614 = vrot.lane.b32.xlu0 %v1613_v7, %s2488_s10  ;;  %133 = vst [vmem:[#allocation0 + $0x730] sm:$0x3] %v2195_v8 }
  0x2f   :  { %v1622_v11 = vld [vmem:[#allocation0 + $0x501] ss:$8 sm:$0xf0]   ;;  %138 = vst [vmem:[#allocation0 + $0x728] sm:$0x3] %v2196_v9 }
  0x30   :  { %143 = vst [vmem:[#allocation0 + $0x720] sm:$0x3] %v2197_v10  ;;  %v2198_v12 = vld [vmem:[%s3619_s0 + $0x1c6] sm:$0x3]  ;;  %v2199_v13 = vld [vmem:[%s3619_s0 + $0x1c4] sm:$0x3] }
  0x31   :  { %148 = vst [vmem:[#allocation0 + $0x718] sm:$0x3] %v2198_v12  ;;  %v2200_v14 = vld [vmem:[%s3619_s0 + $0x1c2] sm:$0x3]  ;;  %v2201_v15 = vld [vmem:[%s3619_s0 + $0x1c0] sm:$0x3] }
  0x32   :  { %v1620_v16 = vld [vmem:[#allocation0 + $0x501] ss:$8 sm:$0xf]   ;;  %153 = vst [vmem:[#allocation0 + $0x710] sm:$0x3] %v2199_v13 }
  0x33   :  { %158 = vst [vmem:[#allocation0 + $0x708] sm:$0x3] %v2200_v14  ;;  %163 = vst [vmem:[#allocation0 + $0x700] sm:$0x3] %v2201_v15  ;;  %v2410_v17 = vld [vmem:[%s3619_s0 + $0x1e] sm:$0x3]  ;;  %v1624_v18 = vsel %vm1282_vm0, %v1622_v11, %v1620_v16 }
  0x34   :  { %v1633_v19 = vld [vmem:[#allocation0 + $0x601] ss:$8 sm:$0xf0]   ;;  %1208 = vst [vmem:[#allocation0 + $0x78] sm:$0x3] %v2410_v17  ;;  %1625 = vrot.lane.b32.xlu1 %v1624_v18, %s2488_s10 }
  0x35   :  { %v2411_v20 = vld [vmem:[%s3619_s0 + $0x1c] sm:$0x3]  ;;  %v2412_v21 = vld [vmem:[%s3619_s0 + $0x1a] sm:$0x3]  ;;  %v2413_v22 = vld [vmem:[%s3619_s0 + $0x18] sm:$0x3] }
  0x36   :  { %1213 = vst [vmem:[#allocation0 + $0x70] sm:$0x3] %v2411_v20  ;;  %v2414_v23 = vld [vmem:[%s3619_s0 + $0x16] sm:$0x3]  ;;  %1218 = vst [vmem:[#allocation0 + $0x68] sm:$0x3] %v2412_v21 }
  0x37   :  { %v1631_v24 = vld [vmem:[#allocation0 + $0x601] ss:$8 sm:$0xf]   ;;  %1223 = vst [vmem:[#allocation0 + $0x60] sm:$0x3] %v2413_v22 }
  0x38   :  { %1228 = vst [vmem:[#allocation0 + $0x58] sm:$0x3] %v2414_v23  ;;  %v2415_v25 = vld [vmem:[%s3619_s0 + $0x14] sm:$0x3]  ;;  %v1635_v26 = vsel %vm1282_vm0, %v1633_v19, %v1631_v24  ;;  %v2416_v27 = vld [vmem:[%s3619_s0 + $0x12] sm:$0x3] }
  0x39   :  { %1233 = vst [vmem:[#allocation0 + $0x50] sm:$0x3] %v2415_v25  ;;  %v2417_v28 = vld [vmem:[%s3619_s0 + $0x10] sm:$0x3]  ;;  %v2378_v29 = vld [vmem:[%s3619_s0 + $0x5e] sm:$0x3]  ;;  %1636 = vrot.lane.b32.xlu0 %v1635_v26, %s2488_s10 }
  0x3a   :  { %v1644_v30 = vld [vmem:[#allocation0 + $0x701] ss:$8 sm:$0xf0]   ;;  %1238 = vst [vmem:[#allocation0 + $0x48] sm:$0x3] %v2416_v27 }
  0x3b   :  { %1243 = vst [vmem:[#allocation0 + $0x40] sm:$0x3] %v2417_v28  ;;  %1048 = vst [vmem:[#allocation0 + $0x178] sm:$0x3] %v2378_v29  ;;  %v2379_v31 = vld [vmem:[%s3619_s0 + $0x5c] sm:$0x3] }
  0x3c   :  { %1053 = vst [vmem:[#allocation0 + $0x170] sm:$0x3] %v2379_v31  ;;  %v2380_v32 = vld [vmem:[%s3619_s0 + $0x5a] sm:$0x3]  ;;  %v2381_v33 = vld [vmem:[%s3619_s0 + $0x58] sm:$0x3] }
  0x3d   :  { %v2382_v34 = vld [vmem:[%s3619_s0 + $0x56] sm:$0x3]  ;;  %v1642_v35 = vld [vmem:[#allocation0 + $0x701] ss:$8 sm:$0xf]  }
  0x3e   :  { %1058 = vst [vmem:[#allocation0 + $0x168] sm:$0x3] %v2380_v32  ;;  %1063 = vst [vmem:[#allocation0 + $0x160] sm:$0x3] %v2381_v33  ;;  %v2383_v36 = vld [vmem:[%s3619_s0 + $0x54] sm:$0x3]  ;;  %v1646_v37 = vsel %vm1282_vm0, %v1644_v30, %v1642_v35 }
  0x3f   :  { %1068 = vst [vmem:[#allocation0 + $0x158] sm:$0x3] %v2382_v34  ;;  %1073 = vst [vmem:[#allocation0 + $0x150] sm:$0x3] %v2383_v36  ;;  %v2384_v38 = vld [vmem:[%s3619_s0 + $0x52] sm:$0x3]  ;;  %1647 = vrot.lane.b32.xlu1 %v1646_v37, %s2488_s10 }
  0x40   :  { %v2385_v39 = vld [vmem:[%s3619_s0 + $0x50] sm:$0x3]  ;;  %v2346_v40 = vld [vmem:[%s3619_s0 + $0x9e] sm:$0x3]  ;;  %1078 = vst [vmem:[#allocation0 + $0x148] sm:$0x3] %v2384_v38 }
  0x41   :  { %1083 = vst [vmem:[#allocation0 + $0x140] sm:$0x3] %v2385_v39  ;;  %888 = vst [vmem:[#allocation0 + $0x278] sm:$0x3] %v2346_v40  ;;  %v2347_v41 = vld [vmem:[%s3619_s0 + $0x9c] sm:$0x3] }
  0x42   :  { %v2348_v42 = vld [vmem:[%s3619_s0 + $0x9a] sm:$0x3]  ;;  %v2349_v43 = vld [vmem:[%s3619_s0 + $0x98] sm:$0x3]  ;;  %893 = vst [vmem:[#allocation0 + $0x270] sm:$0x3] %v2347_v41 }
  0x43   :  { %v1655_v44 = vld [vmem:[#allocation0 + $0x41] ss:$8 sm:$0xf0]   ;;  %898 = vst [vmem:[#allocation0 + $0x268] sm:$0x3] %v2348_v42 }
  0x44   :  { %903 = vst [vmem:[#allocation0 + $0x260] sm:$0x3] %v2349_v43  ;;  %v2350_v45 = vld [vmem:[%s3619_s0 + $0x96] sm:$0x3]  ;;  %v2351_v46 = vld [vmem:[%s3619_s0 + $0x94] sm:$0x3] }
  0x45   :  { %908 = vst [vmem:[#allocation0 + $0x258] sm:$0x3] %v2350_v45  ;;  %v2352_v47 = vld [vmem:[%s3619_s0 + $0x92] sm:$0x3]  ;;  %v2353_v48 = vld [vmem:[%s3619_s0 + $0x90] sm:$0x3] }
  0x46   :  { %v1653_v49 = vld [vmem:[#allocation0 + $0x41] ss:$8 sm:$0xf]   ;;  %913 = vst [vmem:[#allocation0 + $0x250] sm:$0x3] %v2351_v46 }
  0x47   :  { %918 = vst [vmem:[#allocation0 + $0x248] sm:$0x3] %v2352_v47  ;;  %923 = vst [vmem:[#allocation0 + $0x240] sm:$0x3] %v2353_v48  ;;  %v2314_v50 = vld [vmem:[%s3619_s0 + $0xde] sm:$0x3]  ;;  %v1657_v51 = vsel %vm1282_vm0, %v1655_v44, %v1653_v49 }
  0x48   :  { %728 = vst [vmem:[#allocation0 + $0x378] sm:$0x3] %v2314_v50  ;;  %v2315_v52 = vld [vmem:[%s3619_s0 + $0xdc] sm:$0x3]  ;;  %v2316_v53 = vld [vmem:[%s3619_s0 + $0xda] sm:$0x3]  ;;  %1658 = vrot.lane.b32.xlu0 %v1657_v51, %s2488_s10 }
  0x49   :  { %v2317_v54 = vld [vmem:[%s3619_s0 + $0xd8] sm:$0x3]  ;;  %733 = vst [vmem:[#allocation0 + $0x370] sm:$0x3] %v2315_v52  ;;  %738 = vst [vmem:[#allocation0 + $0x368] sm:$0x3] %v2316_v53 }
  0x4a   :  { %v1666_v55 = vld [vmem:[#allocation0 + $0x141] ss:$8 sm:$0xf0]   ;;  %743 = vst [vmem:[#allocation0 + $0x360] sm:$0x3] %v2317_v54 }
  0x4b   :  { %v2318_v56 = vld [vmem:[%s3619_s0 + $0xd6] sm:$0x3]  ;;  %v2319_v57 = vld [vmem:[%s3619_s0 + $0xd4] sm:$0x3]  ;;  %v2320_v58 = vld [vmem:[%s3619_s0 + $0xd2] sm:$0x3] }
  0x4c   :  { %748 = vst [vmem:[#allocation0 + $0x358] sm:$0x3] %v2318_v56  ;;  %v2321_v59 = vld [vmem:[%s3619_s0 + $0xd0] sm:$0x3]  ;;  %753 = vst [vmem:[#allocation0 + $0x350] sm:$0x3] %v2319_v57 }
  0x4d   :  { %v1664_v60 = vld [vmem:[#allocation0 + $0x141] ss:$8 sm:$0xf]   ;;  %758 = vst [vmem:[#allocation0 + $0x348] sm:$0x3] %v2320_v58 }
  0x4e   :  { %763 = vst [vmem:[#allocation0 + $0x340] sm:$0x3] %v2321_v59  ;;  %v2282_v61 = vld [vmem:[%s3619_s0 + $0x11e] sm:$0x3]  ;;  %v1668_v62 = vsel %vm1282_vm0, %v1666_v55, %v1664_v60  ;;  %v2283_v0 = vld [vmem:[%s3619_s0 + $0x11c] sm:$0x3] }
  0x4f   :  { %v1677_v63 = vld [vmem:[#allocation0 + $0x241] ss:$8 sm:$0xf0]   ;;  %568 = vst [vmem:[#allocation0 + $0x478] sm:$0x3] %v2282_v61  ;;  %1669 = vrot.lane.b32.xlu1 %v1668_v62, %s2488_s10 }
  0x50   :  { %573 = vst [vmem:[#allocation0 + $0x470] sm:$0x3] %v2283_v0  ;;  %v2284_v1 = vld [vmem:[%s3619_s0 + $0x11a] sm:$0x3]  ;;  %v2285_v2 = vld [vmem:[%s3619_s0 + $0x118] sm:$0x3] }
  0x51   :  { %v2286_v3 = vld [vmem:[%s3619_s0 + $0x116] sm:$0x3]  ;;  %v1675_v4 = vld [vmem:[#allocation0 + $0x241] ss:$8 sm:$0xf]  }
  0x52   :  { %578 = vst [vmem:[#allocation0 + $0x468] sm:$0x3] %v2284_v1  ;;  %583 = vst [vmem:[#allocation0 + $0x460] sm:$0x3] %v2285_v2  ;;  %v2287_v5 = vld [vmem:[%s3619_s0 + $0x114] sm:$0x3]  ;;  %v1679_v6 = vsel %vm1282_vm0, %v1677_v63, %v1675_v4 }
  0x53   :  { %588 = vst [vmem:[#allocation0 + $0x458] sm:$0x3] %v2286_v3  ;;  %593 = vst [vmem:[#allocation0 + $0x450] sm:$0x3] %v2287_v5  ;;  %v2288_v7 = vld [vmem:[%s3619_s0 + $0x112] sm:$0x3]  ;;  %1680 = vrot.lane.b32.xlu0 %v1679_v6, %s2488_s10 }
  0x54   :  { %v2289_v8 = vld [vmem:[%s3619_s0 + $0x110] sm:$0x3]  ;;  %v2250_v9 = vld [vmem:[%s3619_s0 + $0x15e] sm:$0x3]  ;;  %598 = vst [vmem:[#allocation0 + $0x448] sm:$0x3] %v2288_v7 }
  0x55   :  { %v1688_v10 = vld [vmem:[#allocation0 + $0x341] ss:$8 sm:$0xf0]   ;;  %603 = vst [vmem:[#allocation0 + $0x440] sm:$0x3] %v2289_v8 }
  0x56   :  { %408 = vst [vmem:[#allocation0 + $0x578] sm:$0x3] %v2250_v9  ;;  %v2251_v11 = vld [vmem:[%s3619_s0 + $0x15c] sm:$0x3]  ;;  %v2252_v12 = vld [vmem:[%s3619_s0 + $0x15a] sm:$0x3] }
  0x57   :  { %413 = vst [vmem:[#allocation0 + $0x570] sm:$0x3] %v2251_v11  ;;  %v2253_v13 = vld [vmem:[%s3619_s0 + $0x158] sm:$0x3]  ;;  %v2254_v14 = vld [vmem:[%s3619_s0 + $0x156] sm:$0x3] }
  0x58   :  { %v1686_v15 = vld [vmem:[#allocation0 + $0x341] ss:$8 sm:$0xf]   ;;  %418 = vst [vmem:[#allocation0 + $0x568] sm:$0x3] %v2252_v12 }
  0x59   :  { %423 = vst [vmem:[#allocation0 + $0x560] sm:$0x3] %v2253_v13  ;;  %428 = vst [vmem:[#allocation0 + $0x558] sm:$0x3] %v2254_v14  ;;  %v2255_v16 = vld [vmem:[%s3619_s0 + $0x154] sm:$0x3]  ;;  %v1690_v17 = vsel %vm1282_vm0, %v1688_v10, %v1686_v15 }
  0x5a   :  { %433 = vst [vmem:[#allocation0 + $0x550] sm:$0x3] %v2255_v16  ;;  %v2256_v18 = vld [vmem:[%s3619_s0 + $0x152] sm:$0x3]  ;;  %v2257_v19 = vld [vmem:[%s3619_s0 + $0x150] sm:$0x3]  ;;  %1691 = vrot.lane.b32.xlu1 %v1690_v17, %s2488_s10 }
  0x5b   :  { %v2218_v20 = vld [vmem:[%s3619_s0 + $0x19e] sm:$0x3]  ;;  %438 = vst [vmem:[#allocation0 + $0x548] sm:$0x3] %v2256_v18  ;;  %443 = vst [vmem:[#allocation0 + $0x540] sm:$0x3] %v2257_v19 }
  0x5c   :  { %248 = vst [vmem:[#allocation0 + $0x678] sm:$0x3] %v2218_v20  ;;  %v2219_v21 = vld [vmem:[%s3619_s0 + $0x19c] sm:$0x3]  ;;  %v2220_v22 = vld [vmem:[%s3619_s0 + $0x19a] sm:$0x3] }
  0x5d   :  { %v2221_v23 = vld [vmem:[%s3619_s0 + $0x198] sm:$0x3]  ;;  %253 = vst [vmem:[#allocation0 + $0x670] sm:$0x3] %v2219_v21  ;;  %258 = vst [vmem:[#allocation0 + $0x668] sm:$0x3] %v2220_v22 }
  0x5e   :  { %v1699_v24 = vld [vmem:[#allocation0 + $0x441] ss:$8 sm:$0xf0]   ;;  %263 = vst [vmem:[#allocation0 + $0x660] sm:$0x3] %v2221_v23 }
  0x5f   :  { %v2222_v25 = vld [vmem:[%s3619_s0 + $0x196] sm:$0x3]  ;;  %v2223_v26 = vld [vmem:[%s3619_s0 + $0x194] sm:$0x3]  ;;  %v2224_v27 = vld [vmem:[%s3619_s0 + $0x192] sm:$0x3] }
  0x60   :  { %268 = vst [vmem:[#allocation0 + $0x658] sm:$0x3] %v2222_v25  ;;  %v2225_v28 = vld [vmem:[%s3619_s0 + $0x190] sm:$0x3]  ;;  %273 = vst [vmem:[#allocation0 + $0x650] sm:$0x3] %v2223_v26 }
  0x61   :  { %v1697_v29 = vld [vmem:[#allocation0 + $0x441] ss:$8 sm:$0xf]   ;;  %278 = vst [vmem:[#allocation0 + $0x648] sm:$0x3] %v2224_v27 }
  0x62   :  { %283 = vst [vmem:[#allocation0 + $0x640] sm:$0x3] %v2225_v28  ;;  %v2186_v30 = vld [vmem:[%s3619_s0 + $0x1de] sm:$0x3]  ;;  %v1701_v31 = vsel %vm1282_vm0, %v1699_v24, %v1697_v29  ;;  %v2187_v32 = vld [vmem:[%s3619_s0 + $0x1dc] sm:$0x3] }
  0x63   :  { %88 = vst [vmem:[#allocation0 + $0x778] sm:$0x3] %v2186_v30  ;;  %v2188_v33 = vld [vmem:[%s3619_s0 + $0x1da] sm:$0x3]  ;;  %v2189_v34 = vld [vmem:[%s3619_s0 + $0x1d8] sm:$0x3]  ;;  %1702 = vrot.lane.b32.xlu0 %v1701_v31, %s2488_s10 }
  0x64   :  { %v1710_v35 = vld [vmem:[#allocation0 + $0x541] ss:$8 sm:$0xf0]   ;;  %93 = vst [vmem:[#allocation0 + $0x770] sm:$0x3] %v2187_v32 }
  0x65   :  { %98 = vst [vmem:[#allocation0 + $0x768] sm:$0x3] %v2188_v33  ;;  %103 = vst [vmem:[#allocation0 + $0x760] sm:$0x3] %v2189_v34  ;;  %v2190_v36 = vld [vmem:[%s3619_s0 + $0x1d6] sm:$0x3] }
  0x66   :  { %108 = vst [vmem:[#allocation0 + $0x758] sm:$0x3] %v2190_v36  ;;  %v2191_v37 = vld [vmem:[%s3619_s0 + $0x1d4] sm:$0x3]  ;;  %v2192_v38 = vld [vmem:[%s3619_s0 + $0x1d2] sm:$0x3] }
  0x67   :  { %v2193_v39 = vld [vmem:[%s3619_s0 + $0x1d0] sm:$0x3]  ;;  %113 = vst [vmem:[#allocation0 + $0x750] sm:$0x3] %v2191_v37  ;;  %118 = vst [vmem:[#allocation0 + $0x748] sm:$0x3] %v2192_v38 }
  0x68   :  { %v1708_v40 = vld [vmem:[#allocation0 + $0x541] ss:$8 sm:$0xf]   ;;  %123 = vst [vmem:[#allocation0 + $0x740] sm:$0x3] %v2193_v39 }
  0x69   :  { %v2402_v41 = vld [vmem:[%s3619_s0 + $0x2e] sm:$0x3]  ;;  %v1712_v42 = vsel %vm1282_vm0, %v1710_v35, %v1708_v40  ;;  %v1721_v43 = vld [vmem:[#allocation0 + $0x641] ss:$8 sm:$0xf0]  }
  0x6a   :  { %1168 = vst [vmem:[#allocation0 + $0xb8] sm:$0x3] %v2402_v41  ;;  %v2403_v44 = vld [vmem:[%s3619_s0 + $0x2c] sm:$0x3]  ;;  %1713 = vrot.lane.b32.xlu1 %v1712_v42, %s2488_s10  ;;  %v2404_v45 = vld [vmem:[%s3619_s0 + $0x2a] sm:$0x3] }
  0x6b   :  { %1173 = vst [vmem:[#allocation0 + $0xb0] sm:$0x3] %v2403_v44  ;;  %v2405_v46 = vld [vmem:[%s3619_s0 + $0x28] sm:$0x3]  ;;  %v2406_v47 = vld [vmem:[%s3619_s0 + $0x26] sm:$0x3] }
  0x6c   :  { %v1719_v48 = vld [vmem:[#allocation0 + $0x641] ss:$8 sm:$0xf]   ;;  %1178 = vst [vmem:[#allocation0 + $0xa8] sm:$0x3] %v2404_v45 }
  0x6d   :  { %1183 = vst [vmem:[#allocation0 + $0xa0] sm:$0x3] %v2405_v46  ;;  %1188 = vst [vmem:[#allocation0 + $0x98] sm:$0x3] %v2406_v47  ;;  %v2407_v49 = vld [vmem:[%s3619_s0 + $0x24] sm:$0x3]  ;;  %v1723_v50 = vsel %vm1282_vm0, %v1721_v43, %v1719_v48 }
  0x6e   :  { %1193 = vst [vmem:[#allocation0 + $0x90] sm:$0x3] %v2407_v49  ;;  %v2408_v51 = vld [vmem:[%s3619_s0 + $0x22] sm:$0x3]  ;;  %v2409_v52 = vld [vmem:[%s3619_s0 + $0x20] sm:$0x3]  ;;  %1724 = vrot.lane.b32.xlu0 %v1723_v50, %s2488_s10 }
  0x6f   :  { %v2370_v53 = vld [vmem:[%s3619_s0 + $0x6e] sm:$0x3]  ;;  %v1732_v54 = vld [vmem:[#allocation0 + $0x741] ss:$8 sm:$0xf0]  }
  0x70   :  { %1198 = vst [vmem:[#allocation0 + $0x88] sm:$0x3] %v2408_v51  ;;  %1203 = vst [vmem:[#allocation0 + $0x80] sm:$0x3] %v2409_v52  ;;  %v2371_v55 = vld [vmem:[%s3619_s0 + $0x6c] sm:$0x3] }
  0x71   :  { %1008 = vst [vmem:[#allocation0 + $0x1b8] sm:$0x3] %v2370_v53  ;;  %1013 = vst [vmem:[#allocation0 + $0x1b0] sm:$0x3] %v2371_v55  ;;  %v2372_v56 = vld [vmem:[%s3619_s0 + $0x6a] sm:$0x3] }
  0x72   :  { %v2373_v57 = vld [vmem:[%s3619_s0 + $0x68] sm:$0x3]  ;;  %v2374_v58 = vld [vmem:[%s3619_s0 + $0x66] sm:$0x3]  ;;  %1018 = vst [vmem:[#allocation0 + $0x1a8] sm:$0x3] %v2372_v56 }
  0x73   :  { %v1730_v59 = vld [vmem:[#allocation0 + $0x741] ss:$8 sm:$0xf]   ;;  %1023 = vst [vmem:[#allocation0 + $0x1a0] sm:$0x3] %v2373_v57 }
  0x74   :  { %1028 = vst [vmem:[#allocation0 + $0x198] sm:$0x3] %v2374_v58  ;;  %v2375_v60 = vld [vmem:[%s3619_s0 + $0x64] sm:$0x3]  ;;  %v1734_v61 = vsel %vm1282_vm0, %v1732_v54, %v1730_v59  ;;  %v2376_v62 = vld [vmem:[%s3619_s0 + $0x62] sm:$0x3] }
  0x75   :  { %1033 = vst [vmem:[#allocation0 + $0x190] sm:$0x3] %v2375_v60  ;;  %v2377_v63 = vld [vmem:[%s3619_s0 + $0x60] sm:$0x3]  ;;  %v2338_v0 = vld [vmem:[%s3619_s0 + $0xae] sm:$0x3]  ;;  %1735 = vrot.lane.b32.xlu1 %v1734_v61, %s2488_s10 }
  0x76   :  { %1038 = vst [vmem:[#allocation0 + $0x188] sm:$0x3] %v2376_v62  ;;  %1043 = vst [vmem:[#allocation0 + $0x180] sm:$0x3] %v2377_v63  ;;  %v2339_v1 = vld [vmem:[%s3619_s0 + $0xac] sm:$0x3] }
  0x77   :  { %848 = vst [vmem:[#allocation0 + $0x2b8] sm:$0x3] %v2338_v0  ;;  %v2340_v2 = vld [vmem:[%s3619_s0 + $0xaa] sm:$0x3]  ;;  %v2341_v3 = vld [vmem:[%s3619_s0 + $0xa8] sm:$0x3] }
  0x78   :  { %v1743_v4 = vld [vmem:[#allocation0 + $0x81] ss:$8 sm:$0xf0]   ;;  %853 = vst [vmem:[#allocation0 + $0x2b0] sm:$0x3] %v2339_v1 }
  0x79   :  { %858 = vst [vmem:[#allocation0 + $0x2a8] sm:$0x3] %v2340_v2  ;;  %863 = vst [vmem:[#allocation0 + $0x2a0] sm:$0x3] %v2341_v3  ;;  %v2342_v5 = vld [vmem:[%s3619_s0 + $0xa6] sm:$0x3] }
  0x7a   :  { %868 = vst [vmem:[#allocation0 + $0x298] sm:$0x3] %v2342_v5  ;;  %v2343_v6 = vld [vmem:[%s3619_s0 + $0xa4] sm:$0x3]  ;;  %v2344_v7 = vld [vmem:[%s3619_s0 + $0xa2] sm:$0x3] }
  0x7b   :  { %v2345_v8 = vld [vmem:[%s3619_s0 + $0xa0] sm:$0x3]  ;;  %873 = vst [vmem:[#allocation0 + $0x290] sm:$0x3] %v2343_v6  ;;  %878 = vst [vmem:[#allocation0 + $0x288] sm:$0x3] %v2344_v7 }
  0x7c   :  { %v1741_v9 = vld [vmem:[#allocation0 + $0x81] ss:$8 sm:$0xf]   ;;  %883 = vst [vmem:[#allocation0 + $0x280] sm:$0x3] %v2345_v8 }
  0x7d   :  { %v2306_v10 = vld [vmem:[%s3619_s0 + $0xee] sm:$0x3]  ;;  %v1745_v11 = vsel %vm1282_vm0, %v1743_v4, %v1741_v9  ;;  %v2307_v12 = vld [vmem:[%s3619_s0 + $0xec] sm:$0x3]  ;;  %v2308_v13 = vld [vmem:[%s3619_s0 + $0xea] sm:$0x3] }
  0x7e   :  { %688 = vst [vmem:[#allocation0 + $0x3b8] sm:$0x3] %v2306_v10  ;;  %v2309_v14 = vld [vmem:[%s3619_s0 + $0xe8] sm:$0x3]  ;;  %1746 = vrot.lane.b32.xlu0 %v1745_v11, %s2488_s10  ;;  %693 = vst [vmem:[#allocation0 + $0x3b0] sm:$0x3] %v2307_v12 }
  0x7f   :  { %v1754_v15 = vld [vmem:[#allocation0 + $0x181] ss:$8 sm:$0xf0]   ;;  %698 = vst [vmem:[#allocation0 + $0x3a8] sm:$0x3] %v2308_v13 }
  0x80   :  { %703 = vst [vmem:[#allocation0 + $0x3a0] sm:$0x3] %v2309_v14  ;;  %v2310_v16 = vld [vmem:[%s3619_s0 + $0xe6] sm:$0x3]  ;;  %v2311_v17 = vld [vmem:[%s3619_s0 + $0xe4] sm:$0x3] }
  0x81   :  { %708 = vst [vmem:[#allocation0 + $0x398] sm:$0x3] %v2310_v16  ;;  %v2312_v18 = vld [vmem:[%s3619_s0 + $0xe2] sm:$0x3]  ;;  %v2313_v19 = vld [vmem:[%s3619_s0 + $0xe0] sm:$0x3] }
  0x82   :  { %v1752_v20 = vld [vmem:[#allocation0 + $0x181] ss:$8 sm:$0xf]   ;;  %713 = vst [vmem:[#allocation0 + $0x390] sm:$0x3] %v2311_v17 }
  0x83   :  { %718 = vst [vmem:[#allocation0 + $0x388] sm:$0x3] %v2312_v18  ;;  %723 = vst [vmem:[#allocation0 + $0x380] sm:$0x3] %v2313_v19  ;;  %v2274_v21 = vld [vmem:[%s3619_s0 + $0x12e] sm:$0x3]  ;;  %v1756_v22 = vsel %vm1282_vm0, %v1754_v15, %v1752_v20 }
  0x84   :  { %v1765_v23 = vld [vmem:[#allocation0 + $0x281] ss:$8 sm:$0xf0]   ;;  %528 = vst [vmem:[#allocation0 + $0x4b8] sm:$0x3] %v2274_v21  ;;  %1757 = vrot.lane.b32.xlu1 %v1756_v22, %s2488_s10 }
  0x85   :  { %v2275_v24 = vld [vmem:[%s3619_s0 + $0x12c] sm:$0x3]  ;;  %v2276_v25 = vld [vmem:[%s3619_s0 + $0x12a] sm:$0x3]  ;;  %v2277_v26 = vld [vmem:[%s3619_s0 + $0x128] sm:$0x3] }
  0x86   :  { %533 = vst [vmem:[#allocation0 + $0x4b0] sm:$0x3] %v2275_v24  ;;  %v2278_v27 = vld [vmem:[%s3619_s0 + $0x126] sm:$0x3]  ;;  %538 = vst [vmem:[#allocation0 + $0x4a8] sm:$0x3] %v2276_v25 }
  0x87   :  { %v1763_v28 = vld [vmem:[#allocation0 + $0x281] ss:$8 sm:$0xf]   ;;  %543 = vst [vmem:[#allocation0 + $0x4a0] sm:$0x3] %v2277_v26 }
  0x88   :  { %548 = vst [vmem:[#allocation0 + $0x498] sm:$0x3] %v2278_v27  ;;  %v2279_v29 = vld [vmem:[%s3619_s0 + $0x124] sm:$0x3]  ;;  %v1767_v30 = vsel %vm1282_vm0, %v1765_v23, %v1763_v28  ;;  %v2280_v31 = vld [vmem:[%s3619_s0 + $0x122] sm:$0x3] }
  0x89   :  { %553 = vst [vmem:[#allocation0 + $0x490] sm:$0x3] %v2279_v29  ;;  %v2281_v32 = vld [vmem:[%s3619_s0 + $0x120] sm:$0x3]  ;;  %v2242_v33 = vld [vmem:[%s3619_s0 + $0x16e] sm:$0x3]  ;;  %1768 = vrot.lane.b32.xlu0 %v1767_v30, %s2488_s10 }
  0x8a   :  { %v1776_v34 = vld [vmem:[#allocation0 + $0x381] ss:$8 sm:$0xf0]   ;;  %558 = vst [vmem:[#allocation0 + $0x488] sm:$0x3] %v2280_v31 }
  0x8b   :  { %563 = vst [vmem:[#allocation0 + $0x480] sm:$0x3] %v2281_v32  ;;  %368 = vst [vmem:[#allocation0 + $0x5b8] sm:$0x3] %v2242_v33  ;;  %v2243_v35 = vld [vmem:[%s3619_s0 + $0x16c] sm:$0x3] }
  0x8c   :  { %373 = vst [vmem:[#allocation0 + $0x5b0] sm:$0x3] %v2243_v35  ;;  %v2244_v36 = vld [vmem:[%s3619_s0 + $0x16a] sm:$0x3]  ;;  %v2245_v37 = vld [vmem:[%s3619_s0 + $0x168] sm:$0x3] }
  0x8d   :  { %v2246_v38 = vld [vmem:[%s3619_s0 + $0x166] sm:$0x3]  ;;  %v1774_v39 = vld [vmem:[#allocation0 + $0x381] ss:$8 sm:$0xf]  }
  0x8e   :  { %378 = vst [vmem:[#allocation0 + $0x5a8] sm:$0x3] %v2244_v36  ;;  %383 = vst [vmem:[#allocation0 + $0x5a0] sm:$0x3] %v2245_v37  ;;  %v2247_v40 = vld [vmem:[%s3619_s0 + $0x164] sm:$0x3]  ;;  %v1778_v41 = vsel %vm1282_vm0, %v1776_v34, %v1774_v39 }
  0x8f   :  { %388 = vst [vmem:[#allocation0 + $0x598] sm:$0x3] %v2246_v38  ;;  %393 = vst [vmem:[#allocation0 + $0x590] sm:$0x3] %v2247_v40  ;;  %v2248_v42 = vld [vmem:[%s3619_s0 + $0x162] sm:$0x3]  ;;  %1779 = vrot.lane.b32.xlu1 %v1778_v41, %s2488_s10 }
  0x90   :  { %v2249_v43 = vld [vmem:[%s3619_s0 + $0x160] sm:$0x3]  ;;  %v2210_v44 = vld [vmem:[%s3619_s0 + $0x1ae] sm:$0x3]  ;;  %398 = vst [vmem:[#allocation0 + $0x588] sm:$0x3] %v2248_v42 }
  0x91   :  { %403 = vst [vmem:[#allocation0 + $0x580] sm:$0x3] %v2249_v43  ;;  %208 = vst [vmem:[#allocation0 + $0x6b8] sm:$0x3] %v2210_v44  ;;  %v2211_v45 = vld [vmem:[%s3619_s0 + $0x1ac] sm:$0x3] }
  0x92   :  { %v2212_v46 = vld [vmem:[%s3619_s0 + $0x1aa] sm:$0x3]  ;;  %v2213_v47 = vld [vmem:[%s3619_s0 + $0x1a8] sm:$0x3]  ;;  %213 = vst [vmem:[#allocation0 + $0x6b0] sm:$0x3] %v2211_v45 }
  0x93   :  { %v1787_v48 = vld [vmem:[#allocation0 + $0x481] ss:$8 sm:$0xf0]   ;;  %218 = vst [vmem:[#allocation0 + $0x6a8] sm:$0x3] %v2212_v46 }
  0x94   :  { %223 = vst [vmem:[#allocation0 + $0x6a0] sm:$0x3] %v2213_v47  ;;  %v2214_v49 = vld [vmem:[%s3619_s0 + $0x1a6] sm:$0x3]  ;;  %v2215_v50 = vld [vmem:[%s3619_s0 + $0x1a4] sm:$0x3] }
  0x95   :  { %228 = vst [vmem:[#allocation0 + $0x698] sm:$0x3] %v2214_v49  ;;  %v2216_v51 = vld [vmem:[%s3619_s0 + $0x1a2] sm:$0x3]  ;;  %v2217_v52 = vld [vmem:[%s3619_s0 + $0x1a0] sm:$0x3] }
  0x96   :  { %v1785_v53 = vld [vmem:[#allocation0 + $0x481] ss:$8 sm:$0xf]   ;;  %233 = vst [vmem:[#allocation0 + $0x690] sm:$0x3] %v2215_v50 }
  0x97   :  { %238 = vst [vmem:[#allocation0 + $0x688] sm:$0x3] %v2216_v51  ;;  %243 = vst [vmem:[#allocation0 + $0x680] sm:$0x3] %v2217_v52  ;;  %v2178_v54 = vld [vmem:[%s3619_s0 + $0x1ee] sm:$0x3]  ;;  %v1789_v55 = vsel %vm1282_vm0, %v1787_v48, %v1785_v53 }
  0x98   :  { %48 = vst [vmem:[#allocation0 + $0x7b8] sm:$0x3] %v2178_v54  ;;  %v2179_v56 = vld [vmem:[%s3619_s0 + $0x1ec] sm:$0x3]  ;;  %v2180_v57 = vld [vmem:[%s3619_s0 + $0x1ea] sm:$0x3]  ;;  %1790 = vrot.lane.b32.xlu0 %v1789_v55, %s2488_s10 }
  0x99   :  { %v2181_v58 = vld [vmem:[%s3619_s0 + $0x1e8] sm:$0x3]  ;;  %53 = vst [vmem:[#allocation0 + $0x7b0] sm:$0x3] %v2179_v56  ;;  %58 = vst [vmem:[#allocation0 + $0x7a8] sm:$0x3] %v2180_v57 }
  0x9a   :  { %v1798_v59 = vld [vmem:[#allocation0 + $0x581] ss:$8 sm:$0xf0]   ;;  %63 = vst [vmem:[#allocation0 + $0x7a0] sm:$0x3] %v2181_v58 }
  0x9b   :  { %v2182_v60 = vld [vmem:[%s3619_s0 + $0x1e6] sm:$0x3]  ;;  %v2183_v61 = vld [vmem:[%s3619_s0 + $0x1e4] sm:$0x3]  ;;  %v2184_v62 = vld [vmem:[%s3619_s0 + $0x1e2] sm:$0x3] }
  0x9c   :  { %68 = vst [vmem:[#allocation0 + $0x798] sm:$0x3] %v2182_v60  ;;  %v2185_v63 = vld [vmem:[%s3619_s0 + $0x1e0] sm:$0x3]  ;;  %73 = vst [vmem:[#allocation0 + $0x790] sm:$0x3] %v2183_v61 }
  0x9d   :  { %v1796_v0 = vld [vmem:[#allocation0 + $0x581] ss:$8 sm:$0xf]   ;;  %78 = vst [vmem:[#allocation0 + $0x788] sm:$0x3] %v2184_v62 }
  0x9e   :  { %83 = vst [vmem:[#allocation0 + $0x780] sm:$0x3] %v2185_v63  ;;  %v2394_v1 = vld [vmem:[%s3619_s0 + $0x3e] sm:$0x3]  ;;  %v1800_v2 = vsel %vm1282_vm0, %v1798_v59, %v1796_v0  ;;  %v2395_v4 = vld [vmem:[%s3619_s0 + $0x3c] sm:$0x3] }
  0x9f   :  { %v1809_v3 = vld [vmem:[#allocation0 + $0x681] ss:$8 sm:$0xf0]   ;;  %1128 = vst [vmem:[#allocation0 + $0xf8] sm:$0x3] %v2394_v1  ;;  %1801 = vrot.lane.b32.xlu1 %v1800_v2, %s2488_s10 }
  0xa0   :  { %1133 = vst [vmem:[#allocation0 + $0xf0] sm:$0x3] %v2395_v4  ;;  %v2396_v5 = vld [vmem:[%s3619_s0 + $0x3a] sm:$0x3]  ;;  %v2397_v6 = vld [vmem:[%s3619_s0 + $0x38] sm:$0x3] }
  0xa1   :  { %v2398_v7 = vld [vmem:[%s3619_s0 + $0x36] sm:$0x3]  ;;  %v1807_v8 = vld [vmem:[#allocation0 + $0x681] ss:$8 sm:$0xf]  }
  0xa2   :  { %1138 = vst [vmem:[#allocation0 + $0xe8] sm:$0x3] %v2396_v5  ;;  %1143 = vst [vmem:[#allocation0 + $0xe0] sm:$0x3] %v2397_v6  ;;  %v2399_v9 = vld [vmem:[%s3619_s0 + $0x34] sm:$0x3]  ;;  %v1811_v10 = vsel %vm1282_vm0, %v1809_v3, %v1807_v8 }
  0xa3   :  { %1148 = vst [vmem:[#allocation0 + $0xd8] sm:$0x3] %v2398_v7  ;;  %1153 = vst [vmem:[#allocation0 + $0xd0] sm:$0x3] %v2399_v9  ;;  %v2400_v11 = vld [vmem:[%s3619_s0 + $0x32] sm:$0x3]  ;;  %1812 = vrot.lane.b32.xlu0 %v1811_v10, %s2488_s10 }
  0xa4   :  { %v2401_v12 = vld [vmem:[%s3619_s0 + $0x30] sm:$0x3]  ;;  %v2362_v13 = vld [vmem:[%s3619_s0 + $0x7e] sm:$0x3]  ;;  %1158 = vst [vmem:[#allocation0 + $0xc8] sm:$0x3] %v2400_v11 }
  0xa5   :  { %v1820_v14 = vld [vmem:[#allocation0 + $0x781] ss:$8 sm:$0xf0]   ;;  %1163 = vst [vmem:[#allocation0 + $0xc0] sm:$0x3] %v2401_v12 }
  0xa6   :  { %968 = vst [vmem:[#allocation0 + $0x1f8] sm:$0x3] %v2362_v13  ;;  %v2363_v15 = vld [vmem:[%s3619_s0 + $0x7c] sm:$0x3]  ;;  %v2364_v16 = vld [vmem:[%s3619_s0 + $0x7a] sm:$0x3] }
  0xa7   :  { %973 = vst [vmem:[#allocation0 + $0x1f0] sm:$0x3] %v2363_v15  ;;  %v2365_v17 = vld [vmem:[%s3619_s0 + $0x78] sm:$0x3]  ;;  %v2366_v18 = vld [vmem:[%s3619_s0 + $0x76] sm:$0x3] }
  0xa8   :  { %v1818_v19 = vld [vmem:[#allocation0 + $0x781] ss:$8 sm:$0xf]   ;;  %978 = vst [vmem:[#allocation0 + $0x1e8] sm:$0x3] %v2364_v16 }
  0xa9   :  { %983 = vst [vmem:[#allocation0 + $0x1e0] sm:$0x3] %v2365_v17  ;;  %988 = vst [vmem:[#allocation0 + $0x1d8] sm:$0x3] %v2366_v18  ;;  %v2367_v20 = vld [vmem:[%s3619_s0 + $0x74] sm:$0x3]  ;;  %v1822_v21 = vsel %vm1282_vm0, %v1820_v14, %v1818_v19 }
  0xaa   :  { %993 = vst [vmem:[#allocation0 + $0x1d0] sm:$0x3] %v2367_v20  ;;  %v2368_v22 = vld [vmem:[%s3619_s0 + $0x72] sm:$0x3]  ;;  %v2369_v23 = vld [vmem:[%s3619_s0 + $0x70] sm:$0x3]  ;;  %1823 = vrot.lane.b32.xlu1 %v1822_v21, %s2488_s10 }
  0xab   :  { %v2330_v24 = vld [vmem:[%s3619_s0 + $0xbe] sm:$0x3]  ;;  %998 = vst [vmem:[#allocation0 + $0x1c8] sm:$0x3] %v2368_v22  ;;  %1003 = vst [vmem:[#allocation0 + $0x1c0] sm:$0x3] %v2369_v23 }
  0xac   :  { %808 = vst [vmem:[#allocation0 + $0x2f8] sm:$0x3] %v2330_v24  ;;  %v2331_v25 = vld [vmem:[%s3619_s0 + $0xbc] sm:$0x3]  ;;  %v2332_v26 = vld [vmem:[%s3619_s0 + $0xba] sm:$0x3] }
  0xad   :  { %v2333_v27 = vld [vmem:[%s3619_s0 + $0xb8] sm:$0x3]  ;;  %813 = vst [vmem:[#allocation0 + $0x2f0] sm:$0x3] %v2331_v25  ;;  %818 = vst [vmem:[#allocation0 + $0x2e8] sm:$0x3] %v2332_v26 }
  0xae   :  { %v1831_v28 = vld [vmem:[#allocation0 + $0xc1] ss:$8 sm:$0xf0]   ;;  %823 = vst [vmem:[#allocation0 + $0x2e0] sm:$0x3] %v2333_v27 }
  0xaf   :  { %v2334_v29 = vld [vmem:[%s3619_s0 + $0xb6] sm:$0x3]  ;;  %v2335_v30 = vld [vmem:[%s3619_s0 + $0xb4] sm:$0x3]  ;;  %v2336_v31 = vld [vmem:[%s3619_s0 + $0xb2] sm:$0x3] }
  0xb0   :  { %828 = vst [vmem:[#allocation0 + $0x2d8] sm:$0x3] %v2334_v29  ;;  %v2337_v32 = vld [vmem:[%s3619_s0 + $0xb0] sm:$0x3]  ;;  %833 = vst [vmem:[#allocation0 + $0x2d0] sm:$0x3] %v2335_v30 }
  0xb1   :  { %v1829_v33 = vld [vmem:[#allocation0 + $0xc1] ss:$8 sm:$0xf]   ;;  %838 = vst [vmem:[#allocation0 + $0x2c8] sm:$0x3] %v2336_v31 }
  0xb2   :  { %843 = vst [vmem:[#allocation0 + $0x2c0] sm:$0x3] %v2337_v32  ;;  %v2298_v34 = vld [vmem:[%s3619_s0 + $0xfe] sm:$0x3]  ;;  %v1833_v35 = vsel %vm1282_vm0, %v1831_v28, %v1829_v33  ;;  %v2299_v36 = vld [vmem:[%s3619_s0 + $0xfc] sm:$0x3]  ;;  %v1572_v28 = vpop.permute.xlu0 %1571  }
  0xb3   :  { %648 = vst [vmem:[#allocation0 + $0x3f8] sm:$0x3] %v2298_v34  ;;  %v2300_v37 = vld [vmem:[%s3619_s0 + $0xfa] sm:$0x3]  ;;  %v2301_v38 = vld [vmem:[%s3619_s0 + $0xf8] sm:$0x3]  ;;  %1834 = vrot.lane.b32.xlu0 %v1833_v35, %s2488_s10 }
  0xb4   :  { %v1842_v39 = vld [vmem:[#allocation0 + $0x1c1] ss:$8 sm:$0xf0]   ;;  %653 = vst [vmem:[#allocation0 + $0x3f0] sm:$0x3] %v2299_v36 }
  0xb5   :  { %658 = vst [vmem:[#allocation0 + $0x3e8] sm:$0x3] %v2300_v37  ;;  %663 = vst [vmem:[#allocation0 + $0x3e0] sm:$0x3] %v2301_v38  ;;  %v2302_v40 = vld [vmem:[%s3619_s0 + $0xf6] sm:$0x3]  ;;  %v1593_v37 = vpop.permute.xlu1 %1592  }
  0xb6   :  { %668 = vst [vmem:[#allocation0 + $0x3d8] sm:$0x3] %v2302_v40  ;;  %v2303_v41 = vld [vmem:[%s3619_s0 + $0xf4] sm:$0x3]  ;;  %v2304_v42 = vld [vmem:[%s3619_s0 + $0xf2] sm:$0x3] }
  0xb7   :  { %v2305_v43 = vld [vmem:[%s3619_s0 + $0xf0] sm:$0x3]  ;;  %673 = vst [vmem:[#allocation0 + $0x3d0] sm:$0x3] %v2303_v41  ;;  %678 = vst [vmem:[#allocation0 + $0x3c8] sm:$0x3] %v2304_v42 }
  0xb8   :  { %v1840_v44 = vld [vmem:[#allocation0 + $0x1c1] ss:$8 sm:$0xf]   ;;  %683 = vst [vmem:[#allocation0 + $0x3c0] sm:$0x3] %v2305_v43 }
  0xb9   :  { %v2266_v45 = vld [vmem:[%s3619_s0 + $0x13e] sm:$0x3]  ;;  %v1844_v46 = vsel %vm1282_vm0, %v1842_v39, %v1840_v44  ;;  %v1853_v47 = vld [vmem:[#allocation0 + $0x2c1] ss:$8 sm:$0xf0]  }
  0xba   :  { %488 = vst [vmem:[#allocation0 + $0x4f8] sm:$0x3] %v2266_v45  ;;  %v2267_v48 = vld [vmem:[%s3619_s0 + $0x13c] sm:$0x3]  ;;  %1845 = vrot.lane.b32.xlu1 %v1844_v46, %s2488_s10  ;;  %v2268_v49 = vld [vmem:[%s3619_s0 + $0x13a] sm:$0x3] }
  0xbb   :  { %493 = vst [vmem:[#allocation0 + $0x4f0] sm:$0x3] %v2267_v48  ;;  %v2269_v50 = vld [vmem:[%s3619_s0 + $0x138] sm:$0x3]  ;;  %v2270_v51 = vld [vmem:[%s3619_s0 + $0x136] sm:$0x3] }
  0xbc   :  { %v1851_v52 = vld [vmem:[#allocation0 + $0x2c1] ss:$8 sm:$0xf]   ;;  %498 = vst [vmem:[#allocation0 + $0x4e8] sm:$0x3] %v2268_v49 }
  0xbd   :  { %503 = vst [vmem:[#allocation0 + $0x4e0] sm:$0x3] %v2269_v50  ;;  %508 = vst [vmem:[#allocation0 + $0x4d8] sm:$0x3] %v2270_v51  ;;  %v2271_v53 = vld [vmem:[%s3619_s0 + $0x134] sm:$0x3]  ;;  %v1855_v54 = vsel %vm1282_vm0, %v1853_v47, %v1851_v52  ;;  %v1582_v47 = vpop.permute.xlu0 %1581  }
  0xbe   :  { %513 = vst [vmem:[#allocation0 + $0x4d0] sm:$0x3] %v2271_v53  ;;  %v2272_v55 = vld [vmem:[%s3619_s0 + $0x132] sm:$0x3]  ;;  %v2273_v56 = vld [vmem:[%s3619_s0 + $0x130] sm:$0x3]  ;;  %1856 = vrot.lane.b32.xlu0 %v1855_v54, %s2488_s10 }
  0xbf   :  { %v2234_v57 = vld [vmem:[%s3619_s0 + $0x17e] sm:$0x3]  ;;  %v1864_v58 = vld [vmem:[#allocation0 + $0x3c1] ss:$8 sm:$0xf0]  }
  0xc0   :  { %518 = vst [vmem:[#allocation0 + $0x4c8] sm:$0x3] %v2272_v55  ;;  %523 = vst [vmem:[#allocation0 + $0x4c0] sm:$0x3] %v2273_v56  ;;  %v2235_v59 = vld [vmem:[%s3619_s0 + $0x17c] sm:$0x3] }
  0xc1   :  { %328 = vst [vmem:[#allocation0 + $0x5f8] sm:$0x3] %v2234_v57  ;;  %333 = vst [vmem:[#allocation0 + $0x5f0] sm:$0x3] %v2235_v59  ;;  %v2236_v60 = vld [vmem:[%s3619_s0 + $0x17a] sm:$0x3]  ;;  %v1604_v59 = vpop.permute.xlu1 %1603  }
  0xc2   :  { %v2237_v61 = vld [vmem:[%s3619_s0 + $0x178] sm:$0x3]  ;;  %v2238_v62 = vld [vmem:[%s3619_s0 + $0x176] sm:$0x3]  ;;  %338 = vst [vmem:[#allocation0 + $0x5e8] sm:$0x3] %v2236_v60 }
  0xc3   :  { %v1862_v63 = vld [vmem:[#allocation0 + $0x3c1] ss:$8 sm:$0xf]   ;;  %343 = vst [vmem:[#allocation0 + $0x5e0] sm:$0x3] %v2237_v61 }
  0xc4   :  { %348 = vst [vmem:[#allocation0 + $0x5d8] sm:$0x3] %v2238_v62  ;;  %v2239_v0 = vld [vmem:[%s3619_s0 + $0x174] sm:$0x3]  ;;  %v1866_v1 = vsel %vm1282_vm0, %v1864_v58, %v1862_v63  ;;  %v2240_v2 = vld [vmem:[%s3619_s0 + $0x172] sm:$0x3] }
  0xc5   :  { %353 = vst [vmem:[#allocation0 + $0x5d0] sm:$0x3] %v2239_v0  ;;  %v2241_v3 = vld [vmem:[%s3619_s0 + $0x170] sm:$0x3]  ;;  %v2202_v4 = vld [vmem:[%s3619_s0 + $0x1be] sm:$0x3]  ;;  %1867 = vrot.lane.b32.xlu1 %v1866_v1, %s2488_s10 }
  0xc6   :  { %358 = vst [vmem:[#allocation0 + $0x5c8] sm:$0x3] %v2240_v2  ;;  %363 = vst [vmem:[#allocation0 + $0x5c0] sm:$0x3] %v2241_v3  ;;  %v2203_v5 = vld [vmem:[%s3619_s0 + $0x1bc] sm:$0x3] }
  0xc7   :  { %168 = vst [vmem:[#allocation0 + $0x6f8] sm:$0x3] %v2202_v4  ;;  %v2204_v6 = vld [vmem:[%s3619_s0 + $0x1ba] sm:$0x3]  ;;  %v2205_v7 = vld [vmem:[%s3619_s0 + $0x1b8] sm:$0x3] }
  0xc8   :  { %v1875_v8 = vld [vmem:[#allocation0 + $0x4c1] ss:$8 sm:$0xf0]   ;;  %173 = vst [vmem:[#allocation0 + $0x6f0] sm:$0x3] %v2203_v5 }
  0xc9   :  { %178 = vst [vmem:[#allocation0 + $0x6e8] sm:$0x3] %v2204_v6  ;;  %183 = vst [vmem:[#allocation0 + $0x6e0] sm:$0x3] %v2205_v7  ;;  %v2206_v9 = vld [vmem:[%s3619_s0 + $0x1b6] sm:$0x3] }
  0xca   :  { %188 = vst [vmem:[#allocation0 + $0x6d8] sm:$0x3] %v2206_v9  ;;  %v2207_v10 = vld [vmem:[%s3619_s0 + $0x1b4] sm:$0x3]  ;;  %v2208_v11 = vld [vmem:[%s3619_s0 + $0x1b2] sm:$0x3] }
  0xcb   :  { %v2209_v12 = vld [vmem:[%s3619_s0 + $0x1b0] sm:$0x3]  ;;  %193 = vst [vmem:[#allocation0 + $0x6d0] sm:$0x3] %v2207_v10  ;;  %198 = vst [vmem:[#allocation0 + $0x6c8] sm:$0x3] %v2208_v11  ;;  %v1615_v11 = vpop.permute.xlu0 %1614  }
  0xcc   :  { %v1873_v13 = vld [vmem:[#allocation0 + $0x4c1] ss:$8 sm:$0xf]   ;;  %203 = vst [vmem:[#allocation0 + $0x6c0] sm:$0x3] %v2209_v12 }
  0xcd   :  { %v2170_v14 = vld [vmem:[%s3619_s0 + $0x1fe] sm:$0x3]  ;;  %v1877_v15 = vsel %vm1282_vm0, %v1875_v8, %v1873_v13  ;;  %v2171_v16 = vld [vmem:[%s3619_s0 + $0x1fc] sm:$0x3]  ;;  %v2172_v17 = vld [vmem:[%s3619_s0 + $0x1fa] sm:$0x3] }
  0xce   :  { %8 = vst [vmem:[#allocation0 + $0x7f8] sm:$0x3] %v2170_v14  ;;  %v2173_v18 = vld [vmem:[%s3619_s0 + $0x1f8] sm:$0x3]  ;;  %1878 = vrot.lane.b32.xlu0 %v1877_v15, %s2488_s10  ;;  %13 = vst [vmem:[#allocation0 + $0x7f0] sm:$0x3] %v2171_v16 }
  0xcf   :  { %v1886_v19 = vld [vmem:[#allocation0 + $0x5c1] ss:$8 sm:$0xf0]   ;;  %18 = vst [vmem:[#allocation0 + $0x7e8] sm:$0x3] %v2172_v17 }
  0xd0   :  { %23 = vst [vmem:[#allocation0 + $0x7e0] sm:$0x3] %v2173_v18  ;;  %v2174_v20 = vld [vmem:[%s3619_s0 + $0x1f6] sm:$0x3]  ;;  %v2175_v21 = vld [vmem:[%s3619_s0 + $0x1f4] sm:$0x3] }
  0xd1   :  { %28 = vst [vmem:[#allocation0 + $0x7d8] sm:$0x3] %v2174_v20  ;;  %v2176_v22 = vld [vmem:[%s3619_s0 + $0x1f2] sm:$0x3]  ;;  %v2177_v23 = vld [vmem:[%s3619_s0 + $0x1f0] sm:$0x3] }
  0xd2   :  { %v1884_v24 = vld [vmem:[#allocation0 + $0x5c1] ss:$8 sm:$0xf]   ;;  %33 = vst [vmem:[#allocation0 + $0x7d0] sm:$0x3] %v2175_v21 }
  0xd3   :  { %38 = vst [vmem:[#allocation0 + $0x7c8] sm:$0x3] %v2176_v22  ;;  %43 = vst [vmem:[#allocation0 + $0x7c0] sm:$0x3] %v2177_v23  ;;  %v1888_v26 = vsel %vm1282_vm0, %v1886_v19, %v1884_v24  ;;  %v1626_v24 = vpop.permute.xlu1 %1625  }
  0xd4   :  { %v1280_v25 = vld [vmem:[#allocation0] ss:$8 sm:$0xf]   ;;  %v1897_v27 = vld [vmem:[#allocation0 + $0x6c1] ss:$8 sm:$0xf0]   ;;  %1889 = vrot.lane.b32.xlu1 %v1888_v26, %s2488_s10 }
  0xd5   :  { %v1281_v29 = vld [vmem:[#allocation0] ss:$8 sm:$0xf0]   ;;  %v1895_v33 = vld [vmem:[#allocation0 + $0x6c1] ss:$8 sm:$0xf]  }
  0xd6   :  { %v1283_v30 = vsel %vm1282_vm0, %v1281_v29, %v1280_v25  ;;  %v1350_v31 = vld [vmem:[#allocation0 + $0x200] ss:$8 sm:$0xf]   ;;  %v1899_v36 = vsel %vm1282_vm0, %v1897_v27, %v1895_v33 }
  0xd7   :  { %v1352_v32 = vld [vmem:[#allocation0 + $0x200] ss:$8 sm:$0xf0]   ;;  %1285 = vst.msk [vmem:[%s3620_s1] sm:$0xff] %vm1284_vm1, %v1283_v30   ;;  %1900 = vrot.lane.b32.xlu0 %v1899_v36, %s2488_s10 }
  0xd8   :  { %v1354_v34 = vsel %vm1282_vm0, %v1352_v32, %v1350_v31  ;;  %v1314_v35 = vld [vmem:[#allocation0 + $0x100] ss:$8 sm:$0xf]   ;;  %1574 = vst.msk [vmem:[%s3620_s1] sm:$0xff] %vm1573_vm2, %v1572_v28  }
  0xd9   :  { %2432 = vst.msk [vmem:[%s3620_s1 + $0x40] sm:$0xff] %vm1284_vm1, %v1354_v34   ;;  %v1316_v38 = vld [vmem:[#allocation0 + $0x100] ss:$8 sm:$0xf0]   ;;  %v1637_v34 = vpop.permute.xlu0 %1636  }
  0xda   :  { %v1386_v39 = vld [vmem:[#allocation0 + $0x300] ss:$8 sm:$0xf]   ;;  %v1908_v40 = vld [vmem:[#allocation0 + $0x7c1] ss:$8 sm:$0xf0]   ;;  %v1318_v41 = vsel %vm1282_vm0, %v1316_v38, %v1314_v35 }
  0xdb   :  { %2457 = vst.msk [vmem:[%s3620_s1 + $0x40] sm:$0xff] %vm1573_vm2, %v1593_v37   ;;  %v1388_v42 = vld [vmem:[#allocation0 + $0x300] ss:$8 sm:$0xf0]  }
  0xdc   :  { %2428 = vst.msk [vmem:[%s3620_s1 + $0x20] sm:$0xff] %vm1284_vm1, %v1318_v41   ;;  %v1390_v43 = vsel %vm1282_vm0, %v1388_v42, %v1386_v39  ;;  %v1422_v44 = vld [vmem:[#allocation0 + $0x400] ss:$8 sm:$0xf]  }
  0xdd   :  { %v1424_v45 = vld [vmem:[#allocation0 + $0x400] ss:$8 sm:$0xf0]   ;;  %v1906_v46 = vld [vmem:[#allocation0 + $0x7c1] ss:$8 sm:$0xf]  }
  0xde   :  { %2436 = vst.msk [vmem:[%s3620_s1 + $0x60] sm:$0xff] %vm1284_vm1, %v1390_v43   ;;  %v1426_v48 = vsel %vm1282_vm0, %v1424_v45, %v1422_v44  ;;  %v1458_v49 = vld [vmem:[#allocation0 + $0x500] ss:$8 sm:$0xf]   ;;  %v1910_v50 = vsel %vm1282_vm0, %v1908_v40, %v1906_v46 }
  0xdf   :  { %2456 = vst.msk [vmem:[%s3620_s1 + $0x20] sm:$0xff] %vm1573_vm2, %v1582_v47   ;;  %v1460_v51 = vld [vmem:[#allocation0 + $0x500] ss:$8 sm:$0xf0]   ;;  %1911 = vrot.lane.b32.xlu1 %v1910_v50, %s2488_s10  ;;  %2458 = vst.msk [vmem:[%s3620_s1 + $0x60] sm:$0xff] %vm1573_vm2, %v1604_v59   ;;  %v1648_v47 = vpop.permute.xlu1 %1647  }
  0xe0   :  { %2440 = vst.msk [vmem:[%s3620_s1 + $0x80] sm:$0xff] %vm1284_vm1, %v1426_v48   ;;  %v1494_v52 = vld [vmem:[#allocation0 + $0x600] ss:$8 sm:$0xf]   ;;  %v1462_v53 = vsel %vm1282_vm0, %v1460_v51, %v1458_v49 }
  0xe1   :  { %v1496_v54 = vld [vmem:[#allocation0 + $0x600] ss:$8 sm:$0xf0]   ;;  %2444 = vst.msk [vmem:[%s3620_s1 + $0xa0] sm:$0xff] %vm1284_vm1, %v1462_v53  }
  0xe2   :  { %v1530_v55 = vld [vmem:[#allocation0 + $0x700] ss:$8 sm:$0xf]   ;;  %v1498_v56 = vsel %vm1282_vm0, %v1496_v54, %v1494_v52  ;;  %2459 = vst.msk [vmem:[%s3620_s1 + $0x80] sm:$0xff] %vm1573_vm2, %v1615_v11   ;;  %2460 = vst.msk [vmem:[%s3620_s1 + $0xa0] sm:$0xff] %vm1573_vm2, %v1626_v24  }
  0xe3   :  { %v1532_v57 = vld [vmem:[#allocation0 + $0x700] ss:$8 sm:$0xf0]   ;;  %2448 = vst.msk [vmem:[%s3620_s1 + $0xc0] sm:$0xff] %vm1284_vm1, %v1498_v56  }
  0xe4   :  { %v1287_v58 = vld [vmem:[#allocation0 + $0x40] ss:$8 sm:$0xf]   ;;  %v1534_v60 = vsel %vm1282_vm0, %v1532_v57, %v1530_v55  ;;  %2461 = vst.msk [vmem:[%s3620_s1 + $0xc0] sm:$0xff] %vm1573_vm2, %v1637_v34  }
  0xe5   :  { %v1289_v61 = vld [vmem:[#allocation0 + $0x40] ss:$8 sm:$0xf0]   ;;  %2452 = vst.msk [vmem:[%s3620_s1 + $0xe0] sm:$0xff] %vm1284_vm1, %v1534_v60  }
  0xe6   :  { %v1323_v62 = vld [vmem:[#allocation0 + $0x140] ss:$8 sm:$0xf]   ;;  %v1291_v63 = vsel %vm1282_vm0, %v1289_v61, %v1287_v58  ;;  %2462 = vst.msk [vmem:[%s3620_s1 + $0xe0] sm:$0xff] %vm1573_vm2, %v1648_v47  }
  0xe7   :  { %v1325_v0 = vld [vmem:[#allocation0 + $0x140] ss:$8 sm:$0xf0]   ;;  %2425 = vst.msk [vmem:[%s3620_s1 + $0x8] sm:$0xff] %vm1284_vm1, %v1291_v63   ;;  %v1659_v63 = vpop.permute.xlu0 %1658  }
  0xe8   :  { %v1359_v1 = vld [vmem:[#allocation0 + $0x240] ss:$8 sm:$0xf]   ;;  %v1327_v2 = vsel %vm1282_vm0, %v1325_v0, %v1323_v62  ;;  %2463 = vst.msk [vmem:[%s3620_s1 + $0x8] sm:$0xff] %vm1573_vm2, %v1659_v63  }
  0xe9   :  { %v1361_v3 = vld [vmem:[#allocation0 + $0x240] ss:$8 sm:$0xf0]   ;;  %2429 = vst.msk [vmem:[%s3620_s1 + $0x28] sm:$0xff] %vm1284_vm1, %v1327_v2  }
  0xea   :  { %v1395_v4 = vld [vmem:[#allocation0 + $0x340] ss:$8 sm:$0xf]   ;;  %v1363_v5 = vsel %vm1282_vm0, %v1361_v3, %v1359_v1 }
  0xeb   :  { %v1397_v6 = vld [vmem:[#allocation0 + $0x340] ss:$8 sm:$0xf0]   ;;  %2433 = vst.msk [vmem:[%s3620_s1 + $0x48] sm:$0xff] %vm1284_vm1, %v1363_v5  }
  0xec   :  { %v1431_v7 = vld [vmem:[#allocation0 + $0x440] ss:$8 sm:$0xf]   ;;  %v1399_v8 = vsel %vm1282_vm0, %v1397_v6, %v1395_v4 }
  0xed   :  { %v1433_v9 = vld [vmem:[#allocation0 + $0x440] ss:$8 sm:$0xf0]   ;;  %2437 = vst.msk [vmem:[%s3620_s1 + $0x68] sm:$0xff] %vm1284_vm1, %v1399_v8  }
  0xee   :  { %v1467_v10 = vld [vmem:[#allocation0 + $0x540] ss:$8 sm:$0xf]   ;;  %v1435_v12 = vsel %vm1282_vm0, %v1433_v9, %v1431_v7  ;;  %v1670_v9 = vpop.permute.xlu1 %1669  }
  0xef   :  { %v1469_v13 = vld [vmem:[#allocation0 + $0x540] ss:$8 sm:$0xf0]   ;;  %2441 = vst.msk [vmem:[%s3620_s1 + $0x88] sm:$0xff] %vm1284_vm1, %v1435_v12  }
  0xf0   :  { %v1503_v14 = vld [vmem:[#allocation0 + $0x640] ss:$8 sm:$0xf]   ;;  %v1471_v15 = vsel %vm1282_vm0, %v1469_v13, %v1467_v10  ;;  %2464 = vst.msk [vmem:[%s3620_s1 + $0x28] sm:$0xff] %vm1573_vm2, %v1670_v9   ;;  %v1681_v10 = vpop.permute.xlu0 %1680  }
  0xf1   :  { %v1505_v16 = vld [vmem:[#allocation0 + $0x640] ss:$8 sm:$0xf0]   ;;  %2445 = vst.msk [vmem:[%s3620_s1 + $0xa8] sm:$0xff] %vm1284_vm1, %v1471_v15  }
  0xf2   :  { %v1539_v17 = vld [vmem:[#allocation0 + $0x740] ss:$8 sm:$0xf]   ;;  %v1507_v18 = vsel %vm1282_vm0, %v1505_v16, %v1503_v14  ;;  %2465 = vst.msk [vmem:[%s3620_s1 + $0x48] sm:$0xff] %vm1573_vm2, %v1681_v10   ;;  %v1692_v11 = vpop.permute.xlu1 %1691  }
  0xf3   :  { %v1541_v19 = vld [vmem:[#allocation0 + $0x740] ss:$8 sm:$0xf0]   ;;  %2449 = vst.msk [vmem:[%s3620_s1 + $0xc8] sm:$0xff] %vm1284_vm1, %v1507_v18  }
  0xf4   :  { %v1296_v20 = vld [vmem:[#allocation0 + $0x80] ss:$8 sm:$0xf]   ;;  %v1543_v21 = vsel %vm1282_vm0, %v1541_v19, %v1539_v17  ;;  %2466 = vst.msk [vmem:[%s3620_s1 + $0x68] sm:$0xff] %vm1573_vm2, %v1692_v11   ;;  %v1703_v12 = vpop.permute.xlu0 %1702  }
  0xf5   :  { %v1298_v22 = vld [vmem:[#allocation0 + $0x80] ss:$8 sm:$0xf0]   ;;  %2453 = vst.msk [vmem:[%s3620_s1 + $0xe8] sm:$0xff] %vm1284_vm1, %v1543_v21  }
  0xf6   :  { %v1332_v23 = vld [vmem:[#allocation0 + $0x180] ss:$8 sm:$0xf]   ;;  %v1300_v25 = vsel %vm1282_vm0, %v1298_v22, %v1296_v20  ;;  %2467 = vst.msk [vmem:[%s3620_s1 + $0x88] sm:$0xff] %vm1573_vm2, %v1703_v12   ;;  %v1714_v13 = vpop.permute.xlu1 %1713  }
  0xf7   :  { %v1334_v26 = vld [vmem:[#allocation0 + $0x180] ss:$8 sm:$0xf0]   ;;  %2426 = vst.msk [vmem:[%s3620_s1 + $0x10] sm:$0xff] %vm1284_vm1, %v1300_v25  }
  0xf8   :  { %v1368_v27 = vld [vmem:[#allocation0 + $0x280] ss:$8 sm:$0xf]   ;;  %v1336_v28 = vsel %vm1282_vm0, %v1334_v26, %v1332_v23  ;;  %2468 = vst.msk [vmem:[%s3620_s1 + $0xa8] sm:$0xff] %vm1573_vm2, %v1714_v13   ;;  %v1725_v14 = vpop.permute.xlu0 %1724  }
  0xf9   :  { %v1370_v29 = vld [vmem:[#allocation0 + $0x280] ss:$8 sm:$0xf0]   ;;  %2430 = vst.msk [vmem:[%s3620_s1 + $0x30] sm:$0xff] %vm1284_vm1, %v1336_v28  }
  0xfa   :  { %v1404_v30 = vld [vmem:[#allocation0 + $0x380] ss:$8 sm:$0xf]   ;;  %v1372_v31 = vsel %vm1282_vm0, %v1370_v29, %v1368_v27  ;;  %2469 = vst.msk [vmem:[%s3620_s1 + $0xc8] sm:$0xff] %vm1573_vm2, %v1725_v14   ;;  %v1736_v15 = vpop.permute.xlu1 %1735  }
  0xfb   :  { %v1406_v32 = vld [vmem:[#allocation0 + $0x380] ss:$8 sm:$0xf0]   ;;  %2434 = vst.msk [vmem:[%s3620_s1 + $0x50] sm:$0xff] %vm1284_vm1, %v1372_v31  }
  0xfc   :  { %v1440_v33 = vld [vmem:[#allocation0 + $0x480] ss:$8 sm:$0xf]   ;;  %v1408_v35 = vsel %vm1282_vm0, %v1406_v32, %v1404_v30  ;;  %2470 = vst.msk [vmem:[%s3620_s1 + $0xe8] sm:$0xff] %vm1573_vm2, %v1736_v15   ;;  %v1747_v16 = vpop.permute.xlu0 %1746  }
  0xfd   :  { %v1442_v36 = vld [vmem:[#allocation0 + $0x480] ss:$8 sm:$0xf0]   ;;  %2438 = vst.msk [vmem:[%s3620_s1 + $0x70] sm:$0xff] %vm1284_vm1, %v1408_v35  }
  0xfe   :  { %v1476_v37 = vld [vmem:[#allocation0 + $0x580] ss:$8 sm:$0xf]   ;;  %v1444_v38 = vsel %vm1282_vm0, %v1442_v36, %v1440_v33  ;;  %2471 = vst.msk [vmem:[%s3620_s1 + $0x10] sm:$0xff] %vm1573_vm2, %v1747_v16   ;;  %v1758_v17 = vpop.permute.xlu1 %1757  }
  0xff   :  { %v1478_v39 = vld [vmem:[#allocation0 + $0x580] ss:$8 sm:$0xf0]   ;;  %2442 = vst.msk [vmem:[%s3620_s1 + $0x90] sm:$0xff] %vm1284_vm1, %v1444_v38  }
 0x100   :  { %v1512_v40 = vld [vmem:[#allocation0 + $0x680] ss:$8 sm:$0xf]   ;;  %v1480_v41 = vsel %vm1282_vm0, %v1478_v39, %v1476_v37  ;;  %2472 = vst.msk [vmem:[%s3620_s1 + $0x30] sm:$0xff] %vm1573_vm2, %v1758_v17   ;;  %v1769_v18 = vpop.permute.xlu0 %1768  }
 0x101   :  { %v1514_v42 = vld [vmem:[#allocation0 + $0x680] ss:$8 sm:$0xf0]   ;;  %2446 = vst.msk [vmem:[%s3620_s1 + $0xb0] sm:$0xff] %vm1284_vm1, %v1480_v41  }
 0x102   :  { %v1548_v43 = vld [vmem:[#allocation0 + $0x780] ss:$8 sm:$0xf]   ;;  %v1516_v44 = vsel %vm1282_vm0, %v1514_v42, %v1512_v40  ;;  %2473 = vst.msk [vmem:[%s3620_s1 + $0x50] sm:$0xff] %vm1573_vm2, %v1769_v18   ;;  %v1780_v19 = vpop.permute.xlu1 %1779  }
 0x103   :  { %v1550_v45 = vld [vmem:[#allocation0 + $0x780] ss:$8 sm:$0xf0]   ;;  %2450 = vst.msk [vmem:[%s3620_s1 + $0xd0] sm:$0xff] %vm1284_vm1, %v1516_v44  }
 0x104   :  { %v1305_v46 = vld [vmem:[#allocation0 + $0xc0] ss:$8 sm:$0xf]   ;;  %v1552_v48 = vsel %vm1282_vm0, %v1550_v45, %v1548_v43  ;;  %2474 = vst.msk [vmem:[%s3620_s1 + $0x70] sm:$0xff] %vm1573_vm2, %v1780_v19  }
 0x105   :  { %v1307_v49 = vld [vmem:[#allocation0 + $0xc0] ss:$8 sm:$0xf0]   ;;  %2454 = vst.msk [vmem:[%s3620_s1 + $0xf0] sm:$0xff] %vm1284_vm1, %v1552_v48  }
 0x106   :  { %v1341_v50 = vld [vmem:[#allocation0 + $0x1c0] ss:$8 sm:$0xf]   ;;  %v1309_v51 = vsel %vm1282_vm0, %v1307_v49, %v1305_v46 }
 0x107   :  { %v1343_v52 = vld [vmem:[#allocation0 + $0x1c0] ss:$8 sm:$0xf0]   ;;  %2427 = vst.msk [vmem:[%s3620_s1 + $0x18] sm:$0xff] %vm1284_vm1, %v1309_v51  }
 0x108   :  { %v1377_v53 = vld [vmem:[#allocation0 + $0x2c0] ss:$8 sm:$0xf]   ;;  %v1345_v54 = vsel %vm1282_vm0, %v1343_v52, %v1341_v50 }
 0x109   :  { %v1379_v55 = vld [vmem:[#allocation0 + $0x2c0] ss:$8 sm:$0xf0]   ;;  %2431 = vst.msk [vmem:[%s3620_s1 + $0x38] sm:$0xff] %vm1284_vm1, %v1345_v54  }
 0x10a   :  { %v1413_v56 = vld [vmem:[#allocation0 + $0x3c0] ss:$8 sm:$0xf]   ;;  %v1381_v57 = vsel %vm1282_vm0, %v1379_v55, %v1377_v53  ;;  %v1791_v20 = vpop.permute.xlu0 %1790  }
 0x10b   :  { %v1415_v58 = vld [vmem:[#allocation0 + $0x3c0] ss:$8 sm:$0xf0]   ;;  %2435 = vst.msk [vmem:[%s3620_s1 + $0x58] sm:$0xff] %vm1284_vm1, %v1381_v57  }
 0x10c   :  { %v1449_v59 = vld [vmem:[#allocation0 + $0x4c0] ss:$8 sm:$0xf]   ;;  %v1417_v60 = vsel %vm1282_vm0, %v1415_v58, %v1413_v56  ;;  %2475 = vst.msk [vmem:[%s3620_s1 + $0x90] sm:$0xff] %vm1573_vm2, %v1791_v20  }
 0x10d   :  { %v1451_v61 = vld [vmem:[#allocation0 + $0x4c0] ss:$8 sm:$0xf0]   ;;  %2439 = vst.msk [vmem:[%s3620_s1 + $0x78] sm:$0xff] %vm1284_vm1, %v1417_v60  }
 0x10e   :  { %v1485_v62 = vld [vmem:[#allocation0 + $0x5c0] ss:$8 sm:$0xf]   ;;  %v1453_v0 = vsel %vm1282_vm0, %v1451_v61, %v1449_v59 }
 0x10f   :  { %v1487_v1 = vld [vmem:[#allocation0 + $0x5c0] ss:$8 sm:$0xf0]   ;;  %2443 = vst.msk [vmem:[%s3620_s1 + $0x98] sm:$0xff] %vm1284_vm1, %v1453_v0  }
 0x110   :  { %v1521_v2 = vld [vmem:[#allocation0 + $0x6c0] ss:$8 sm:$0xf]   ;;  %v1489_v3 = vsel %vm1282_vm0, %v1487_v1, %v1485_v62 }
 0x111   :  { %v1523_v4 = vld [vmem:[#allocation0 + $0x6c0] ss:$8 sm:$0xf0]   ;;  %2447 = vst.msk [vmem:[%s3620_s1 + $0xb8] sm:$0xff] %vm1284_vm1, %v1489_v3   ;;  %v1802_v21 = vpop.permute.xlu1 %1801  }
 0x112   :  { %v1557_v5 = vld [vmem:[#allocation0 + $0x7c0] ss:$8 sm:$0xf]   ;;  %v1525_v6 = vsel %vm1282_vm0, %v1523_v4, %v1521_v2  ;;  %2476 = vst.msk [vmem:[%s3620_s1 + $0xb0] sm:$0xff] %vm1573_vm2, %v1802_v21  }
 0x113   :  { %v1559_v7 = vld [vmem:[#allocation0 + $0x7c0] ss:$8 sm:$0xf0]   ;;  %2451 = vst.msk [vmem:[%s3620_s1 + $0xd8] sm:$0xff] %vm1284_vm1, %v1525_v6  }
 0x114   :  { %v1561_v8 = vsel %vm1282_vm0, %v1559_v7, %v1557_v5 }
 0x115   :  { %2455 = vst.msk [vmem:[%s3620_s1 + $0xf8] sm:$0xff] %vm1284_vm1, %v1561_v8   ;;  %v1813_v22 = vpop.permute.xlu0 %1812  }
 0x116   :  { %2477 = vst.msk [vmem:[%s3620_s1 + $0xd0] sm:$0xff] %vm1573_vm2, %v1813_v22  }
 0x11c   :  { %v1824_v23 = vpop.permute.xlu1 %1823  }
 0x11d   :  { %2478 = vst.msk [vmem:[%s3620_s1 + $0xf0] sm:$0xff] %vm1573_vm2, %v1824_v23  }
 0x125   :  { %v1835_v24 = vpop.permute.xlu0 %1834  }
 0x126   :  { %2479 = vst.msk [vmem:[%s3620_s1 + $0x18] sm:$0xff] %vm1573_vm2, %v1835_v24  }
 0x12c   :  { %v1846_v25 = vpop.permute.xlu1 %1845  }
 0x12d   :  { %2480 = vst.msk [vmem:[%s3620_s1 + $0x38] sm:$0xff] %vm1573_vm2, %v1846_v25  }
 0x130   :  { %v1857_v26 = vpop.permute.xlu0 %1856  }
 0x131   :  { %2481 = vst.msk [vmem:[%s3620_s1 + $0x58] sm:$0xff] %vm1573_vm2, %v1857_v26  }
 0x137   :  { %v1868_v27 = vpop.permute.xlu1 %1867  }
 0x138   :  { %2482 = vst.msk [vmem:[%s3620_s1 + $0x78] sm:$0xff] %vm1573_vm2, %v1868_v27  }
 0x140   :  { %v1879_v28 = vpop.permute.xlu0 %1878  }
 0x141   :  { %2483 = vst.msk [vmem:[%s3620_s1 + $0x98] sm:$0xff] %vm1573_vm2, %v1879_v28  }
 0x146   :  { %v1890_v29 = vpop.permute.xlu1 %1889  }
 0x147   :  { %2484 = vst.msk [vmem:[%s3620_s1 + $0xb8] sm:$0xff] %vm1573_vm2, %v1890_v29  }
 0x149   :  { %v1901_v30 = vpop.permute.xlu0 %1900  }
 0x14a   :  { %2485 = vst.msk [vmem:[%s3620_s1 + $0xd8] sm:$0xff] %vm1573_vm2, %v1901_v30  }
 0x151   :  { %v1912_v31 = vpop.permute.xlu1 %1911  }
 0x152   :  { %2486 = vst.msk [vmem:[%s3620_s1 + $0xf8] sm:$0xff] %vm1573_vm2, %v1912_v31  }

// kernel: fu_forward.2
= control target key start
LH: loop header
LB: loop body
LE: loop exit
PB: predicated region body
PF: predicated region fallthrough
CT: control target
= control target key end

     0   :  { %s1110_s9 = smov 0   ;;  %s1112_s10 = smov 0   ;;  %s1294_s0 = inlined_call_operand.vmem [shape: f32[2,8,256], index: 0, kind: input, shape index: {}]   ;;  %s1295_s1 = inlined_call_operand.vmem [shape: f32[8,10], index: 1, kind: input, shape index: {}]   ;;  %s1296_s2 = inlined_call_operand.vmem [shape: f32[2,8,256], index: 2, kind: output, shape index: {}]  }
   0x1   :  { %s1114_s11 = smov 0  }
   0x2 LB: > { %s24_s12 = sadd.s32 1, %s1073_s10  ;;  %p963_p0 = scmp.ge.s32.totalorder %s1077_s11, 1  ;;  %s1077_s11 = sphi %s1114_s11, %s12_s11   ;;  %s1073_s10 = sphi %s1112_s10, %s1298_s10   ;;  %s1069_s9 = sphi %s1110_s9, %s1297_s9  }
   0x3   : > { %p26_p1 = scmp.ge.s32.totalorder %s24_s12, 2  ;;  %p133_p2 = scmp.lt.s32.totalorder %s1077_s11, 3 }
   0x5   : > { %s1300_s12 = smov (%p26_p1, %s24_s12), 0  ;;  %p134_p3 = pnand %p963_p0, %p133_p2 }
   0x6   : > { %v185_v0 = vld [vmem:[%s1295_s1] sm:$0xff] (!%p134_p3)  ;;  %p164_p4 = scmp.lt.s32.totalorder (!%p134_p3), %s1069_s9, 1  ;;  %v1079_v1 = vmov (!%p134_p3), 2   ;;  %v1080_v2 = vmov (!%p134_p3), 0   ;;  %v191_v3 = vlaneseq (!%p134_p3)  ;;  %v1081_v5 = vmov (!%p134_p3), 3  }
   0x7   : > { %137 = sbr.rel (%p134_p3) target bundleno = 267 (0x10b), region = 28  ;;  %1038 = vset.pattern.permute.xlu1 (!%p134_p3), %v1079_v1  ;;  %1036 = vset.pattern.permute.xlu0 (!%p134_p3), %v1080_v2  ;;  %v1082_v6 = vmov (!%p134_p3), 1   ;;  %v1083_v19 = vmov (!%p134_p3), 4   ;;  %v1084_v20 = vmov (!%p134_p3), 5   ;;  %v1085_v23 = vmov (!%p134_p3), 6  }
   0x8   : > { %218 = vperm.xlu1 (!%p134_p3), %1038, %v185_v0   ;;  %188 = vperm.xlu0 (!%p134_p3), %1036, %v185_v0   ;;  %v192_v4 = vshrl.u32 (!%p134_p3), %v191_v3, 7  ;;  %v1086_v24 = vmov (!%p134_p3), 8   ;;  %v1087_v25 = vmov (!%p134_p3), 7   ;;  %v1088_v26 = vmov (!%p134_p3), 9  }
   0xa   : > { %v1139_v7 = vsub.s32 (!%p134_p3), 0, %v192_v4  ;;  %v1145_v10 = vsub.s32 (!%p134_p3), 2, %v192_v4  ;;  %v1147_v11 = vsub.s32 (!%p134_p3), 1, %v192_v4  ;;  %v1149_v12 = vsub.s32 (!%p134_p3), 3, %v192_v4 }
   0xb   : > { %v1167_v27 = vsub.s32 (!%p134_p3), 4, %v192_v4  ;;  %v1169_v28 = vsub.s32 (!%p134_p3), 5, %v192_v4  ;;  %v1171_v29 = vsub.s32 (!%p134_p3), 6, %v192_v4  ;;  %v1173_v32 = vsub.s32 (!%p134_p3), 7, %v192_v4 }
   0xc   : > { %1039 = vset.pattern.permute.xlu1 (!%p134_p3), %v1081_v5  ;;  %1037 = vset.pattern.permute.xlu0 (!%p134_p3), %v1082_v6 }
   0xd   : > { %234 = vperm.xlu1 (!%p134_p3), %1039, %v185_v0   ;;  %202 = vperm.xlu0 (!%p134_p3), %1037, %v185_v0  }
   0xe   : > { %s1302_s9 = smov (!%p164_p4, %s1069_s9), 1 }
   0xf   : > { %s986_s15 = sshll.u32 %s1302_s9, 4 }
  0x10   : > { %s171_s18 = scalar_lea.vmem %s1294_s0, %s986_s15  ;;  %s181_s21 = scalar_lea.vmem %s1296_s2, %s986_s15 }
  0x11   : > { %v1141_v8 = vld [vmem:[%s171_s18] sm:$0xff]  ;;  %v1143_v9 = vld [vmem:[%s171_s18 + $0x8] sm:$0xff]  ;;  %1040 = vset.pattern.permute.xlu1 %v1083_v19  ;;  %1041 = vset.pattern.permute.xlu0 %v1084_v20 }
  0x12   : > { %v194_v13 = vrot.slane %v1141_v8, %v1139_v7  ;;  %v198_v14 = vrot.slane %v1143_v9, %v1139_v7  ;;  %v224_v15 = vrot.slane %v1141_v8, %v1145_v10  ;;  %v228_v16 = vrot.slane %v1143_v9, %v1145_v10  ;;  %250 = vperm.xlu1 %1040, %v185_v0  }
  0x13   : > { %v208_v17 = vrot.slane %v1141_v8, %v1147_v11  ;;  %v212_v18 = vrot.slane %v1143_v9, %v1147_v11  ;;  %v240_v21 = vrot.slane %v1141_v8, %v1149_v12  ;;  %v244_v22 = vrot.slane %v1143_v9, %v1149_v12  ;;  %262 = vperm.xlu0 %1041, %v185_v0  }
  0x14   : > { %v332_v35 = vrot.slane %v1141_v8, %v1167_v27  ;;  %v336_v36 = vrot.slane %v1143_v9, %v1167_v27  ;;  %v342_v39 = vrot.slane %v1141_v8, %v1169_v28  ;;  %v346_v40 = vrot.slane %v1143_v9, %v1169_v28 }
  0x15   : > { %v354_v41 = vrot.slane %v1141_v8, %v1171_v29  ;;  %v358_v42 = vrot.slane %v1143_v9, %v1171_v29  ;;  %v366_v47 = vrot.slane %v1141_v8, %v1173_v32  ;;  %v370_v48 = vrot.slane %v1143_v9, %v1173_v32 }
  0x16   : > { %1042 = vset.pattern.permute.xlu1 %v1085_v23 }
  0x17   : > { %1044 = vset.pattern.permute.xlu0 %v1086_v24  ;;  %276 = vperm.xlu1 %1042, %v185_v0  }
  0x18   : > { %308 = vperm.xlu0 %1044, %v185_v0  }
  0x1b   : > { %1043 = vset.pattern.permute.xlu1 %v1087_v25 }
  0x1c   : > { %1046 = vset.pattern.permute.xlu0 %v1088_v26  ;;  %292 = vperm.xlu1 %1043, %v185_v0  }
  0x20   : > { %1045 = vset.pattern.permute.xlu1 %v1088_v26 }
  0x21   : > { %324 = vperm.xlu1 %1045, %v185_v0  }
  0x87   : > { %v189_v30 = vpop.permute.xlu0 %188  ;;  %v219_v31 = vpop.permute.xlu1 %218 }
  0x88   : > { %v199_v33 = vmul.f32 %v194_v13, %v189_v30  ;;  %v200_v34 = vmul.f32 %v198_v14, %v189_v30  ;;  %v229_v37 = vmul.f32 %v224_v15, %v219_v31  ;;  %v230_v38 = vmul.f32 %v228_v16, %v219_v31 }
  0x89   : > { %v337_v43 = vmul.f32 %v332_v35, %v189_v30  ;;  %v338_v44 = vmul.f32 %v336_v36, %v189_v30  ;;  %v359_v53 = vmul.f32 %v354_v41, %v219_v31  ;;  %v360_v54 = vmul.f32 %v358_v42, %v219_v31 }
  0x8c   : > { %v203_v45 = vpop.permute.xlu0 %202  ;;  %v235_v46 = vpop.permute.xlu1 %234 }
  0x8d   : > { %v213_v49 = vmul.f32 %v208_v17, %v203_v45  ;;  %v214_v50 = vmul.f32 %v212_v18, %v203_v45  ;;  %v347_v51 = vmul.f32 %v342_v39, %v203_v45  ;;  %v348_v52 = vmul.f32 %v346_v40, %v203_v45 }
  0x8e   : > { %v245_v55 = vmul.f32 %v240_v21, %v235_v46  ;;  %v246_v56 = vmul.f32 %v244_v22, %v235_v46  ;;  %v371_v61 = vmul.f32 %v366_v47, %v235_v46  ;;  %v372_v62 = vmul.f32 %v370_v48, %v235_v46 }
  0x8f   : > { %v215_v57 = vadd.f32 %v213_v49, %v199_v33  ;;  %v216_v58 = vadd.f32 %v214_v50, %v200_v34  ;;  %v349_v59 = vadd.f32 %v347_v51, %v337_v43  ;;  %v350_v60 = vadd.f32 %v348_v52, %v338_v44 }
  0x91   : > { %v251_v63 = vpop.permute.xlu1 %250  ;;  %v231_v0 = vadd.f32 %v229_v37, %v215_v57  ;;  %v232_v1 = vadd.f32 %v230_v38, %v216_v58  ;;  %v361_v2 = vadd.f32 %v359_v53, %v349_v59  ;;  %v362_v3 = vadd.f32 %v360_v54, %v350_v60 }
  0x92   : > { %v263_v30 = vpop.permute.xlu0 %262 }
  0x93   : > { %v247_v4 = vadd.f32 %v245_v55, %v231_v0  ;;  %v248_v5 = vadd.f32 %v246_v56, %v232_v1  ;;  %v373_v6 = vadd.f32 %v371_v61, %v361_v2  ;;  %v374_v8 = vadd.f32 %v372_v62, %v362_v3 }
  0x95   : > { %v253_v9 = vadd.f32 %v251_v63, %v247_v4  ;;  %v254_v13 = vadd.f32 %v251_v63, %v248_v5  ;;  %v375_v14 = vadd.f32 %v373_v6, %v251_v63  ;;  %v376_v15 = vadd.f32 %v374_v8, %v251_v63 }
  0x96   : > { %v277_v18 = vpop.permute.xlu1 %276 }
  0x97   : > { %vm255_vm0 = vcmp.gt.f32.partialorder %v253_v9, 0.0  ;;  %vm256_vm1 = vcmp.gt.f32.partialorder %v254_v13, 0.0  ;;  %v257_v16 = vmul.f32 0.1, %v253_v9  ;;  %v258_v17 = vmul.f32 0.1, %v254_v13  ;;  %v309_v53 = vpop.permute.xlu0 %308 }
  0x98   : > { %vm377_vm2 = vcmp.gt.f32.partialorder %v375_v14, 0.0  ;;  %vm378_vm3 = vcmp.gt.f32.partialorder %v376_v15, 0.0  ;;  %v379_v19 = vmul.f32 0.1, %v375_v14  ;;  %v380_v20 = vmul.f32 0.1, %v376_v15 }
  0x99   : > { %v259_v21 = vsel %vm255_vm0, %v253_v9, %v257_v16  ;;  %v260_v22 = vsel %vm256_vm1, %v254_v13, %v258_v17 }
  0x9a   : > { %v381_v23 = vsel %vm377_vm2, %v375_v14, %v379_v19  ;;  %v382_v24 = vsel %vm378_vm3, %v376_v15, %v380_v20  ;;  %v282_v25 = vrot.slane %v259_v21, %v1147_v11  ;;  %v286_v26 = vrot.slane %v260_v22, %v1147_v11 }
  0x9b   : > { %v396_v31 = vrot.slane %v381_v23, %v1169_v28  ;;  %v400_v33 = vrot.slane %v382_v24, %v1169_v28  ;;  %v268_v34 = vrot.slane %v259_v21, %v1139_v7  ;;  %v272_v35 = vrot.slane %v260_v22, %v1139_v7  ;;  %v293_v11 = vpop.permute.xlu1 %292 }
  0x9c   : > { %v287_v36 = vmul.f32 %v282_v25, %v277_v18  ;;  %v288_v37 = vmul.f32 %v286_v26, %v277_v18  ;;  %v386_v38 = vrot.slane %v381_v23, %v1167_v27  ;;  %v390_v39 = vrot.slane %v382_v24, %v1167_v27 }
  0x9d   : > { %v401_v40 = vmul.f32 %v396_v31, %v277_v18  ;;  %v402_v41 = vmul.f32 %v400_v33, %v277_v18  ;;  %v273_v42 = vmul.f32 %v268_v34, %v263_v30  ;;  %v274_v43 = vmul.f32 %v272_v35, %v263_v30 }
  0x9e   : > { %v391_v44 = vmul.f32 %v386_v38, %v263_v30  ;;  %v392_v45 = vmul.f32 %v390_v39, %v263_v30  ;;  %v298_v46 = vrot.slane %v259_v21, %v1145_v10  ;;  %v302_v28 = vrot.slane %v260_v22, %v1145_v10 }
  0x9f   : > { %v289_v47 = vadd.f32 %v287_v36, %v273_v42  ;;  %v290_v48 = vadd.f32 %v288_v37, %v274_v43  ;;  %v408_v7 = vrot.slane %v381_v23, %v1171_v29  ;;  %v412_v49 = vrot.slane %v382_v24, %v1171_v29 }
  0xa0   : > { %v403_v50 = vadd.f32 %v401_v40, %v391_v44  ;;  %v404_v51 = vadd.f32 %v402_v41, %v392_v45  ;;  %v303_v27 = vmul.f32 %v298_v46, %v293_v11  ;;  %v304_v52 = vmul.f32 %v302_v28, %v293_v11  ;;  %v325_v2 = vpop.permute.xlu1 %324 }
  0xa1   : > { %v413_v54 = vmul.f32 %v408_v7, %v293_v11  ;;  %v414_v55 = vmul.f32 %v412_v49, %v293_v11  ;;  %v314_v56 = vrot.slane %v259_v21, %v1149_v12  ;;  %v318_v57 = vrot.slane %v260_v22, %v1149_v12 }
  0xa2   : > { %v420_v58 = vrot.slane %v381_v23, %v1173_v32  ;;  %v424_v10 = vrot.slane %v382_v24, %v1173_v32  ;;  %v305_v59 = vadd.f32 %v303_v27, %v289_v47  ;;  %v306_v60 = vadd.f32 %v304_v52, %v290_v48 }
  0xa3   : > { %v319_v61 = vmul.f32 %v314_v56, %v309_v53  ;;  %v320_v62 = vmul.f32 %v318_v57, %v309_v53  ;;  %v415_v29 = vadd.f32 %v413_v54, %v403_v50  ;;  %v416_v63 = vadd.f32 %v414_v55, %v404_v51 }
  0xa4   : > { %v425_v0 = vmul.f32 %v420_v58, %v309_v53  ;;  %v426_v1 = vmul.f32 %v424_v10, %v309_v53  ;;  %v1089_v37 = vmov 683565275   ;;  %v1090_v41 = vmov 2475754826  }
  0xa5   : > { %v321_v3 = vadd.f32 %v319_v61, %v305_v59  ;;  %v322_v4 = vadd.f32 %v320_v62, %v306_v60  ;;  %v1091_v43 = vmov 2131351028   ;;  %v1092_v44 = vmov 2102212464  }
  0xa6   : > { %v427_v5 = vadd.f32 %v425_v0, %v415_v29  ;;  %v428_v6 = vadd.f32 %v426_v1, %v416_v63  ;;  %v1093_v46 = vmov 920167782   ;;  %v1094_v51 = vmov 1326507024  }
  0xa7   : > { %v1207_v8 = vadd.f32 %v325_v2, %v321_v3  ;;  %v1209_v12 = vadd.f32 %v325_v2, %v322_v4 }
  0xa8   : > { %v1211_v9 = vadd.f32 %v427_v5, %v325_v2  ;;  %v1213_v32 = vadd.f32 %v428_v6, %v325_v2 }
  0xaa   : > { %v431_v13 = vand.u32 2147483647, %v1211_v9  ;;  %v434_v14 = vand.u32 2139095040, %v1211_v9  ;;  %v537_v15 = vand.u32 2139095040, %v1213_v32  ;;  %v534_v18 = vand.u32 2147483647, %v1213_v32 }
  0xab   : > { %vm433_vm2 = vcmp.lt.s32.totalorder %v1211_v9, 0 }
  0xac   : > { %v435_v16 = vshrl.u32 %v434_v14, 23  ;;  %v438_v17 = vand.u32 8388607, %v431_v13  ;;  %v538_v19 = vshrl.u32 %v537_v15, 23  ;;  %v1223_v24 = vand.u32 8388607, %v534_v18 }
  0xad   : > { %vm432_vm3 = vcmp.le.f32.partialorder %v431_v13, 0.7853982 }
  0xae   : > { %v968_v20 = vadd.s32 4294967169, %v435_v16  ;;  %v972_v21 = vadd.s32 4294967169, %v538_v19  ;;  %v439_v23 = vor.u32 8388608, %v438_v17  ;;  %v542_v35 = vor.u32 8388608, %v1223_v24 }
  0xb0   : > { %v441_v22 = vadd.s32 1, %v968_v20  ;;  %v544_v25 = vadd.s32 1, %v972_v21  ;;  %v1225_v34 = vshll.u32 %v439_v23, 8 }
  0xb2   : > { %vm442_vm4 = vcmp.gt.s32.totalorder %v441_v22, 0  ;;  %vm545_vm5 = vcmp.gt.s32.totalorder %v544_v25, 0 }
  0xb3   : > { %v443_v26 = vsel %vm442_vm4, %v441_v22, 0  ;;  %v546_v33 = vsel %vm545_vm5, %v544_v25, 0  ;;  %vm536_vm4 = vcmp.lt.s32.totalorder %v1213_v32, 0  ;;  %vm535_vm5 = vcmp.le.f32.partialorder %v534_v18, 0.7853982 }
  0xb4   : > { %v444_v30 = vshrl.u32 %v443_v26, 5  ;;  %v445_v31 = vand.u32 31, %v443_v26  ;;  %v1228_v39 = vshrl.u32 %v546_v33, 5  ;;  %v548_v40 = vand.u32 31, %v546_v33 }
  0xb6   : > { %v446_v36 = vsub.s32 32, %v445_v31  ;;  %v448_v38 = vshll.u32 %v1089_v37, %v445_v31  ;;  %v451_v42 = vshll.u32 %v1090_v41, %v445_v31  ;;  %v454_v11 = vshll.u32 %v1091_v43, %v445_v31 }
  0xb7   : > { %v457_v45 = vshll.u32 %v1092_v44, %v445_v31  ;;  %v460_v28 = vshll.u32 %v1093_v46, %v445_v31  ;;  %vm463_vm6 = vcmp.lt.s32.totalorder %v444_v30, 1  ;;  %vm464_vm7 = vcmp.lt.s32.totalorder %v444_v30, 2 }
  0xb8   : > { %v449_v47 = vshrl.u32 %v1090_v41, %v446_v36  ;;  %v452_v48 = vshrl.u32 %v1091_v43, %v446_v36  ;;  %v455_v7 = vshrl.u32 %v1092_v44, %v446_v36  ;;  %v447_v49 = vshrl.u32 %v1089_v37, %v446_v36 }
  0xb9   : > { %v458_v50 = vshrl.u32 %v1093_v46, %v446_v36  ;;  %v461_v27 = vshrl.u32 %v1094_v51, %v446_v36  ;;  %v549_v55 = vsub.s32 32, %v548_v40  ;;  %vm465_vm8 = vcmp.lt.s32.totalorder %v444_v30, 3 }
  0xba   : > { %v450_v52 = vor.u32 %v449_v47, %v448_v38  ;;  %v453_v53 = vor.u32 %v452_v48, %v451_v42  ;;  %v456_v54 = vor.u32 %v455_v7, %v454_v11  ;;  %vm466_vm9 = vcmp.lt.s32.totalorder %v444_v30, 4 }
  0xbb   : > { %v459_v56 = vor.u32 %v458_v50, %v457_v45  ;;  %v462_v57 = vor.u32 %v461_v27, %v460_v28  ;;  %v551_v63 = vshll.u32 %v1089_v37, %v548_v40  ;;  %v552_v2 = vshrl.u32 %v1090_v41, %v549_v55 }
  0xbc   : > { %v467_v58 = vsel %vm463_vm6, %v447_v49, %v450_v52  ;;  %v468_v10 = vsel %vm466_vm9, %v456_v54, 2102212464  ;;  %v471_v59 = vsel %vm463_vm6, %v450_v52, %v453_v53  ;;  %v475_v60 = vsel %vm463_vm6, %v453_v53, %v456_v54 }
  0xbd   : > { %v469_v61 = vsel %vm465_vm8, %v453_v53, %v468_v10  ;;  %v472_v62 = vsel %vm466_vm9, %v459_v56, 920167782  ;;  %v476_v29 = vsel %vm466_vm9, %v462_v57, 1326507024  ;;  %v554_v3 = vshll.u32 %v1090_v41, %v548_v40 }
  0xbe   : > { %v473_v0 = vsel %vm465_vm8, %v456_v54, %v472_v62  ;;  %v477_v1 = vsel %vm465_vm8, %v459_v56, %v476_v29  ;;  %v470_v4 = vsel %vm464_vm7, %v467_v58, %v469_v61  ;;  %v555_v14 = vshrl.u32 %v1091_v43, %v549_v55 }
  0xbf   : > { %v474_v5 = vsel %vm464_vm7, %v471_v59, %v473_v0  ;;  %v478_v6 = vsel %vm464_vm7, %v475_v60, %v477_v1  ;;  %v553_v20 = vor.u32 %v552_v2, %v551_v63  ;;  %v557_v22 = vshll.u32 %v1091_v43, %v548_v40 }
  0xc0   : > { %v1237_v15 = vmul.u32.u64.low %v1225_v34, %v478_v6  ;;  %v1238_v16 = vmul.u32.u64.high %v1225_v34, %v478_v6, %v1237_v15  ;;  %v1241_v17 = vmul.u32.u64.low %v1225_v34, %v474_v5  ;;  %v1242_v19 = vmul.u32.u64.high %v1225_v34, %v474_v5, %v1241_v17 }
  0xc1   : > { %v556_v21 = vor.u32 %v555_v14, %v554_v3  ;;  %v558_v23 = vshrl.u32 %v1092_v44, %v549_v55  ;;  %v560_v24 = vshll.u32 %v1092_v44, %v548_v40  ;;  %v561_v25 = vshrl.u32 %v1093_v46, %v549_v55 }
  0xc2   : > { %v564_v26 = vshrl.u32 %v1094_v51, %v549_v55  ;;  %v582_v31 = vshll.u32 %v542_v35, 8  ;;  %v486_v30 = vmul.u32 %v1225_v34, %v470_v4  ;;  %v550_v33 = vshrl.u32 %v1089_v37, %v549_v55 }
  0xc3   : > { %v559_v36 = vor.u32 %v558_v23, %v557_v22  ;;  %v563_v38 = vshll.u32 %v1093_v46, %v548_v40  ;;  %vm488_vm10 = vc.u32 %v1238_v16, %v1241_v17  ;;  %v489_v41 = vadd.s32 1, %v1242_v19 }
  0xc4   : > { %v562_v42 = vor.u32 %v561_v25, %v560_v24  ;;  %vm566_vm11 = vcmp.lt.s32.totalorder %v1228_v39, 1  ;;  %vm568_vm12 = vcmp.lt.s32.totalorder %v1228_v39, 3  ;;  %vm569_vm13 = vcmp.lt.s32.totalorder %v1228_v39, 4 }
  0xc5   : > { %v565_v11 = vor.u32 %v564_v26, %v563_v38  ;;  %v574_v43 = vsel %vm566_vm11, %v553_v20, %v556_v21  ;;  %v490_v35 = vsel %vm488_vm10, %v489_v41, %v1242_v19  ;;  %v571_v44 = vsel %vm569_vm13, %v559_v36, 2102212464 }
  0xc6   : > { %v575_v34 = vsel %vm569_vm13, %v562_v42, 920167782  ;;  %v578_v37 = vsel %vm566_vm11, %v556_v21, %v559_v36  ;;  %v491_v45 = vadd.s32 %v490_v35, %v486_v30  ;;  %vm567_vm14 = vcmp.lt.s32.totalorder %v1228_v39, 2 }
  0xc7   : > { %v576_v40 = vsel %vm568_vm12, %v559_v36, %v575_v34  ;;  %v579_v46 = vsel %vm569_vm13, %v565_v11, 1326507024  ;;  %v570_v28 = vsel %vm566_vm11, %v550_v33, %v553_v20  ;;  %v572_v47 = vsel %vm568_vm12, %v556_v21, %v571_v44 }
  0xc8   : > { %v577_v48 = vsel %vm567_vm14, %v574_v43, %v576_v40  ;;  %v580_v7 = vsel %vm568_vm12, %v562_v42, %v579_v46  ;;  %v492_v49 = vadd.s32 536870912, %v491_v45  ;;  %v573_v55 = vsel %vm567_vm14, %v570_v28, %v572_v47 }
  0xc9   : > { %v581_v50 = vsel %vm567_vm14, %v578_v37, %v580_v7  ;;  %v1252_v51 = vmul.u32.u64.low %v582_v31, %v577_v48  ;;  %v1253_v27 = vmul.u32.u64.high %v582_v31, %v577_v48, %v1252_v51  ;;  %v589_v39 = vmul.u32 %v582_v31, %v573_v55 }
  0xca   : > { %v1255_v52 = vmul.u32.u64.low %v582_v31, %v581_v50  ;;  %v1256_v53 = vmul.u32.u64.high %v582_v31, %v581_v50, %v1255_v52  ;;  %v493_v54 = vshrl.u32 %v492_v49, 30  ;;  %v487_v5 = vadd.s32 %v1241_v17, %v1238_v16 }
  0xcb   : > { %v592_v57 = vadd.s32 1, %v1253_v27  ;;  %vm523_vm12 = vweird.f32 %v1211_v9  ;;  %vm867_vm13 = vcmask 1043456  }
  0xcc   : > { %v494_v56 = vshll.u32 %v493_v54, 30  ;;  %vm591_vm15 = vc.u32 %v1256_v53, %v1252_v51  ;;  %v590_v36 = vadd.s32 %v1252_v51, %v1256_v53  ;;  %v517_v17 = vsub.s32 4, %v493_v54 }
  0xcd   : > { %v593_v10 = vsel %vm591_vm15, %v592_v57, %v1253_v27 }
  0xce   : > { %v495_v58 = vsub.s32 %v491_v45, %v494_v56  ;;  %v594_v59 = vadd.s32 %v593_v10, %v589_v39  ;;  %v518_v45 = vsel %vm433_vm2, %v517_v17, %v493_v54 }
  0xcf   : > { %v520_v28 = vsel %vm432_vm3, 0, %v518_v45 }
  0xd0   : > { %v497_v60 = vsub.s32 0, %v495_v58  ;;  %v595_v61 = vadd.s32 536870912, %v594_v59  ;;  %v738_v50 = vadd.s32 3, %v520_v28  ;;  %v524_v52 = vand.u32 3, %v520_v28 }
  0xd2   : > { %v969_v62 = vmin.u32 %v497_v60, %v495_v58  ;;  %v596_v29 = vshrl.u32 %v595_v61, 30  ;;  %v739_v54 = vand.u32 3, %v738_v50  ;;  %vm526_vm6 = vcmp.eq.s32.totalorder %v524_v52, 0 }
  0xd3   : > { %vm529_vm7 = vcmp.eq.s32.totalorder %v524_v52, 2  ;;  %vm525_vm10 = vcmp.lt.s32.totalorder %v524_v52, 2 }
  0xd4   : > { %v499_v63 = vclz %v969_v62  ;;  %v597_v0 = vshll.u32 %v596_v29, 30  ;;  %v620_v49 = vsub.s32 4, %v596_v29  ;;  %vm744_vm8 = vcmp.eq.s32.totalorder %v739_v54, 2 }
  0xd5   : > { %vm741_vm9 = vcmp.eq.s32.totalorder %v739_v54, 0  ;;  %vm740_vm11 = vcmp.lt.s32.totalorder %v739_v54, 2 }
  0xd6   : > { %v970_v1 = vadd.s32 4294967294, %v499_v63  ;;  %v598_v2 = vsub.s32 %v594_v59, %v597_v0  ;;  %v621_v27 = vsel %vm536_vm4, %v620_v49, %v596_v29 }
  0xd7   : > { %v623_v56 = vsel %vm535_vm5, 0, %v621_v27 }
  0xd8   : > { %vm971_vm0 = vcmp.lt.s32.totalorder %v970_v1, 0  ;;  %v600_v4 = vsub.s32 0, %v598_v2  ;;  %v842_v18 = vadd.s32 3, %v623_v56  ;;  %v627_v0 = vand.u32 3, %v623_v56 }
  0xd9   : > { %v502_v3 = vsel %vm971_vm0, 0, %v970_v1 }
  0xda   : > { %v503_v6 = vsub.s32 32, %v502_v3  ;;  %v507_v14 = vsub.s32 4294967266, %v502_v3  ;;  %v973_v15 = vmin.u32 %v600_v4, %v598_v2  ;;  %v504_v19 = vshll.u32 %v495_v58, %v502_v3 }
  0xdb   : > { %v843_v3 = vand.u32 3, %v842_v18  ;;  %vm628_vm14 = vcmp.lt.s32.totalorder %v627_v0, 2  ;;  %vm632_vm15 = vcmp.eq.s32.totalorder %v627_v0, 2 }
  0xdc   : > { %v505_v20 = vshrl.u32 %v487_v5, %v503_v6  ;;  %v508_v21 = vadd.s32 127, %v507_v14  ;;  %v602_v22 = vclz %v973_v15 }
  0xdd   : > { %vm848_vm0 = vcmp.eq.s32.totalorder %v843_v3, 2 }
  0xde   : > { %v506_v23 = vor.u32 %v505_v20, %v504_v19  ;;  %v509_v24 = vshll.u32 %v508_v21, 23  ;;  %v974_v25 = vadd.s32 4294967294, %v602_v22 }
  0xe0   : > { %v510_v26 = vor.u32 4788187, %v509_v24  ;;  %vm975_vm1 = vcmp.lt.s32.totalorder %v974_v25, 0  ;;  %v513_v30 = vcvt.s32.f32 %v506_v23 }
  0xe1   : > { %v605_v33 = vsel %vm975_vm1, 0, %v974_v25  ;;  %vm629_vm1 = vcmp.eq.s32.totalorder %v627_v0, 0 }
  0xe2   : > { %v511_v31 = vand.u32 2147483647, %v510_v26  ;;  %v606_v38 = vsub.s32 32, %v605_v33  ;;  %v610_v41 = vsub.s32 4294967266, %v605_v33  ;;  %v607_v42 = vshll.u32 %v598_v2, %v605_v33 }
  0xe4   : > { %v514_v16 = vmul.f32 %v513_v30, %v511_v31  ;;  %v608_v11 = vshrl.u32 %v590_v36, %v606_v38  ;;  %v611_v43 = vadd.s32 127, %v610_v41 }
  0xe6   : > { %v515_v35 = vxor.u32 2147483648, %v514_v16  ;;  %v609_v44 = vor.u32 %v608_v11, %v607_v42  ;;  %v612_v34 = vshll.u32 %v611_v43, 23 }
  0xe8   : > { %v516_v37 = vsel %vm433_vm2, %v515_v35, %v514_v16  ;;  %v613_v46 = vor.u32 4788187, %v612_v34  ;;  %v616_v48 = vcvt.s32.f32 %v609_v44  ;;  %vm845_vm2 = vcmp.eq.s32.totalorder %v843_v3, 0 }
  0xe9   : > { %v519_v40 = vsel %vm432_vm3, %v1211_v9, %v516_v37  ;;  %vm844_vm3 = vcmp.lt.s32.totalorder %v843_v3, 2 }
  0xea   : > { %1047 = vcosq.f32 %v519_v40  ;;  %v614_v47 = vand.u32 2147483647, %v613_v46 }
  0xeb   : > { %1049 = vsinq.f32 %v519_v40 }
  0xec   : > { %v617_v7 = vmul.f32 %v616_v48, %v614_v47 }
  0xee   : > { %v618_v51 = vxor.u32 2147483648, %v617_v7 }
  0xf0   : > { %v619_v13 = vsel %vm536_vm4, %v618_v51, %v617_v7  ;;  %vm626_vm4 = vweird.f32 %v1213_v32 }
  0xf1   : > { %v622_v53 = vsel %vm535_vm5, %v1213_v32, %v619_v13 }
  0xf2   : > { %1051 = vcosq.f32 %v622_v53 }
  0xf3   : > { %1053 = vsinq.f32 %v622_v53 }
  0xf4   : > { %v1048_v55 = vpop.eup %1047 }
  0xf5   : > { %v1050_v57 = vpop.eup %1049  ;;  %v530_v39 = vxor.u32 2147483648, %v1048_v55 }
  0xf6   : > { %v527_v58 = vxor.u32 2147483648, %v1050_v57 }
  0xf7   : > { %v531_v10 = vsel %vm529_vm7, %v530_v39, %v1050_v57  ;;  %v746_v59 = vsel %vm744_vm8, %v530_v39, %v1050_v57 }
  0xf8   : > { %v528_v60 = vsel %vm526_vm6, %v1048_v55, %v527_v58  ;;  %v743_v61 = vsel %vm741_vm9, %v1048_v55, %v527_v58 }
  0xf9   : > { %v532_v62 = vsel %vm525_vm10, %v528_v60, %v531_v10  ;;  %v747_v29 = vsel %vm740_vm11, %v743_v61, %v746_v59 }
  0xfa   : > { %v533_v63 = vsel %vm523_vm12, nan, %v532_v62  ;;  %v748_v1 = vsel %vm523_vm12, nan, %v747_v29 }
  0xfb   : > { %v639_v2 = vrot.slane %v533_v63, 4  ;;  %v855_v4 = vrot.slane %v748_v1, 4 }
  0xfc   : > { %v1052_v5 = vpop.eup %1051 }
  0xfd   : > { %v643_v6 = vmul.f32 %v639_v2, %v1207_v8  ;;  %v859_v14 = vmul.f32 %v855_v4, %v1207_v8  ;;  %v1054_v15 = vpop.eup %1053  ;;  %v633_v19 = vxor.u32 2147483648, %v1052_v5 }
  0xfe   : > { %v630_v9 = vxor.u32 2147483648, %v1054_v15 }
  0xff   : > { %v863_v20 = vrot.slane %v859_v14, 4  ;;  %v634_v21 = vsel %vm632_vm15, %v633_v19, %v1054_v15  ;;  %v850_v22 = vsel %vm848_vm0, %v633_v19, %v1054_v15 }
 0x100   : > { %v631_v23 = vsel %vm629_vm1, %v1052_v5, %v630_v9  ;;  %v847_v8 = vsel %vm845_vm2, %v1052_v5, %v630_v9 }
 0x101   : > { %v868_v24 = vsel %vm867_vm13, %v643_v6, %v863_v20  ;;  %v635_v25 = vsel %vm628_vm14, %v631_v23, %v634_v21  ;;  %v851_v26 = vsel %vm844_vm3, %v847_v8, %v850_v22 }
 0x102   : > { %870 = vst [vmem:[%s181_s21] sm:$0xff] %v868_v24  ;;  %v636_v31 = vsel %vm626_vm4, nan, %v635_v25  ;;  %v852_v30 = vsel %vm626_vm4, nan, %v851_v26 }
 0x103   : > { %v640_v33 = vrot.slane %v636_v31, 4  ;;  %v856_v36 = vrot.slane %v852_v30, 4 }
 0x105   : > { %v860_v38 = vmul.f32 %v856_v36, %v1209_v12  ;;  %v644_v41 = vmul.f32 %v640_v33, %v1209_v12 }
 0x107   : > { %v864_v16 = vrot.slane %v860_v38, 4 }
 0x109   : > { %v869_v17 = vsel %vm867_vm13, %v644_v41, %v864_v16 }
 0x10a   : > { %871 = vst [vmem:[%s181_s21 + $0x8] sm:$0xff] %v869_v17 }
 0x10b PF: > { %s12_s11 = sadd.s32 1, %s1077_s11   ;;  %s1297_s9 = smov %s1073_s10 }
 0x10c   : > { %p9_p5 = scmp.ge.s32.totalorder %s12_s11, 4   ;;  %s1298_s10 = smov %s1300_s12 }
 0x10e   :  { %11 = sbr.rel (!%p9_p5) target bundleno = 2 (0x2), region = 58 }

// kernel: fu_forward.3
= control target key start
LH: loop header
LB: loop body
LE: loop exit
PB: predicated region body
PF: predicated region fallthrough
CT: control target
= control target key end

     0   :  { %s744_s9 = smov 0   ;;  %s746_s10 = smov 0   ;;  %s970_s0 = inlined_call_operand.vmem [shape: f32[2,8,1024], index: 0, kind: input, shape index: {}]   ;;  %s971_s1 = inlined_call_operand.vmem [shape: f32[2,5], index: 1, kind: input, shape index: {}]   ;;  %s972_s2 = inlined_call_operand.vmem [shape: f32[2,2,1024], index: 2, kind: output, shape index: {}]  }
   0x1   :  { %s748_s11 = smov 0  }
   0x2 LB: > { %s24_s12 = sadd.s32 1, %s717_s10  ;;  %p638_p0 = scmp.ge.s32.totalorder %s721_s11, 1  ;;  %s721_s11 = sphi %s748_s11, %s12_s11   ;;  %s717_s10 = sphi %s746_s10, %s974_s10   ;;  %s713_s9 = sphi %s744_s9, %s973_s9  }
   0x3   : > { %p26_p1 = scmp.ge.s32.totalorder %s24_s12, 2  ;;  %p133_p2 = scmp.lt.s32.totalorder %s721_s11, 3 }
   0x5   : > { %s976_s12 = smov (%p26_p1, %s24_s12), 0  ;;  %p134_p3 = pnand %p638_p0, %p133_p2 }
   0x6   : > { %v287_v0 = vld [vmem:[%s971_s1] sm:$0x3] (!%p134_p3)  ;;  %v723_v1 = vmov (!%p134_p3), 0   ;;  %v724_v2 = vmov (!%p134_p3), 2   ;;  %v725_v3 = vmov (!%p134_p3), 1   ;;  %v726_v4 = vmov (!%p134_p3), 3  }
   0x7   : > { %137 = sbr.rel (%p134_p3) target bundleno = 161 (0xa1), region = 28  ;;  %677 = vset.pattern.permute.xlu0 (!%p134_p3), %v723_v1  ;;  %679 = vset.pattern.permute.xlu1 (!%p134_p3), %v724_v2  ;;  %v727_v5 = vmov (!%p134_p3), 4   ;;  %p164_p4 = scmp.lt.s32.totalorder (!%p134_p3), %s713_s9, 1  ;;  %v293_v38 = vlaneseq (!%p134_p3)  ;;  %v728_v57 = vmov (!%p134_p3), 1983009808  }
   0x8   : > { %290 = vperm.xlu0 (!%p134_p3), %677, %v287_v0   ;;  %386 = vperm.xlu1 (!%p134_p3), %679, %v287_v0   ;;  %v512_v58 = vunpack.c.l.s4 (!%p134_p3), %v728_v57 }
   0x9   : > { %v294_v39 = vshrl.u32 (!%p134_p3), %v293_v38, 7 }
   0xb   : > { %v795_v44 = vsub.s32 (!%p134_p3), 2, %v294_v39  ;;  %v797_v45 = vsub.s32 (!%p134_p3), 0, %v294_v39  ;;  %v799_v46 = vsub.s32 (!%p134_p3), 1, %v294_v39  ;;  %v801_v47 = vsub.s32 (!%p134_p3), 3, %v294_v39 }
   0xc   : > { %678 = vset.pattern.permute.xlu0 (!%p134_p3), %v725_v3  ;;  %680 = vset.pattern.permute.xlu1 (!%p134_p3), %v726_v4 }
   0xd   : > { %334 = vperm.xlu0 (!%p134_p3), %678, %v287_v0   ;;  %438 = vperm.xlu1 (!%p134_p3), %680, %v287_v0  }
   0xe   : > { %s978_s9 = smov (!%p164_p4, %s713_s9), 1 }
   0xf   : > { %s645_s15 = sshll.u32 %s978_s9, 6  ;;  %s646_s19 = sshll.u32 %s978_s9, 4 }
  0x10   : > { %s171_s18 = scalar_lea.vmem %s970_s0, %s645_s15  ;;  %s181_s22 = scalar_lea.vmem %s972_s2, %s646_s19 }
  0x11   : > { %681 = vset.pattern.permute.xlu1 %v727_v5  ;;  %682 = vset.pattern.permute.xlu0 %v727_v5  ;;  %v183_v6 = vld [vmem:[%s171_s18] sm:$0xff]  ;;  %v184_v7 = vld [vmem:[%s171_s18 + $0x8] sm:$0xff]  ;;  %v185_v8 = vld [vmem:[%s171_s18 + $0x10] sm:$0xff]  ;;  %v513_v5 = vunpack.c.0.s8 %v512_v58 }
  0x12   : > { %490 = vperm.xlu1 %681, %v287_v0   ;;  %v186_v9 = vld [vmem:[%s171_s18 + $0x18] sm:$0xff]  ;;  %v191_v10 = vmul.f32 %v183_v6, %v183_v6  ;;  %v187_v11 = vld [vmem:[%s171_s18 + $0x20] sm:$0xff]  ;;  %v192_v12 = vmul.f32 %v184_v7, %v184_v7  ;;  %v188_v13 = vld [vmem:[%s171_s18 + $0x28] sm:$0xff]  ;;  %v193_v14 = vmul.f32 %v185_v8, %v185_v8 }
  0x13   : > { %v189_v15 = vld [vmem:[%s171_s18 + $0x30] sm:$0xff]  ;;  %v194_v16 = vmul.f32 %v186_v9, %v186_v9  ;;  %v190_v17 = vld [vmem:[%s171_s18 + $0x38] sm:$0xff]  ;;  %v195_v18 = vmul.f32 %v187_v11, %v187_v11  ;;  %v196_v20 = vmul.f32 %v188_v13, %v188_v13 }
  0x14   : > { %v207_v19 = vrot.slane %v191_v10, 4  ;;  %v208_v21 = vrot.slane %v192_v12, 4  ;;  %v197_v22 = vmul.f32 %v189_v15, %v189_v15  ;;  %v209_v23 = vrot.slane %v193_v14, 4 }
  0x15   : > { %v198_v24 = vmul.f32 %v190_v17, %v190_v17  ;;  %v210_v25 = vrot.slane %v194_v16, 4  ;;  %v211_v26 = vrot.slane %v195_v18, 4  ;;  %v212_v28 = vrot.slane %v196_v20, 4 }
  0x16   : > { %v771_v27 = vadd.f32 %v207_v19, %v191_v10  ;;  %v773_v29 = vadd.f32 %v208_v21, %v192_v12  ;;  %v213_v30 = vrot.slane %v197_v22, 4  ;;  %v775_v31 = vadd.f32 %v209_v23, %v193_v14 }
  0x17   : > { %v214_v32 = vrot.slane %v198_v24, 4  ;;  %v777_v33 = vadd.f32 %v210_v25, %v194_v16  ;;  %v779_v34 = vadd.f32 %v211_v26, %v195_v18  ;;  %v782_v35 = vadd.f32 %v212_v28, %v196_v20 }
  0x18   : > { %683 = vrsqrt.f32 %v771_v27  ;;  %v785_v36 = vadd.f32 %v213_v30, %v197_v22  ;;  %vm233_vm0 = vcmp.eq.f32.partialorder %v771_v27, inf  ;;  %vm235_vm1 = vcmp.eq.f32.partialorder %v771_v27, 0.0 }
  0x19   : > { %685 = vrsqrt.f32 %v773_v29  ;;  %v788_v37 = vadd.f32 %v214_v32, %v198_v24  ;;  %v236_v49 = vand.u32 2147483648, %v771_v27  ;;  %vm240_vm2 = vcmp.eq.f32.partialorder %v773_v29, inf }
  0x1a   : > { %687 = vrsqrt.f32 %v775_v31  ;;  %vm242_vm3 = vcmp.eq.f32.partialorder %v773_v29, 0.0  ;;  %v243_v51 = vand.u32 2147483648, %v773_v29  ;;  %vm247_vm4 = vcmp.eq.f32.partialorder %v775_v31, inf }
  0x1b   : > { %689 = vrsqrt.f32 %v777_v33  ;;  %vm249_vm5 = vcmp.eq.f32.partialorder %v775_v31, 0.0  ;;  %v250_v53 = vand.u32 2147483648, %v775_v31  ;;  %vm254_vm6 = vcmp.eq.f32.partialorder %v777_v33, inf }
  0x1c   : > { %691 = vrsqrt.f32 %v779_v34  ;;  %vm256_vm7 = vcmp.eq.f32.partialorder %v777_v33, 0.0  ;;  %v257_v56 = vand.u32 2147483648, %v777_v33  ;;  %vm261_vm8 = vcmp.eq.f32.partialorder %v779_v34, inf }
  0x1d   : > { %693 = vrsqrt.f32 %v782_v35  ;;  %vm263_vm9 = vcmp.eq.f32.partialorder %v779_v34, 0.0  ;;  %v264_v61 = vand.u32 2147483648, %v779_v34  ;;  %vm268_vm10 = vcmp.eq.f32.partialorder %v782_v35, inf }
  0x1e   : > { %695 = vrsqrt.f32 %v785_v36  ;;  %vm270_vm11 = vcmp.eq.f32.partialorder %v782_v35, 0.0  ;;  %v271_v1 = vand.u32 2147483648, %v782_v35  ;;  %vm275_vm12 = vcmp.eq.f32.partialorder %v785_v36, inf }
  0x1f   : > { %697 = vrsqrt.f32 %v788_v37  ;;  %vm282_vm13 = vcmp.eq.f32.partialorder %v788_v37, inf  ;;  %vm277_vm14 = vcmp.eq.f32.partialorder %v785_v36, 0.0  ;;  %v278_v8 = vand.u32 2147483648, %v785_v36 }
  0x20   : > { %vm284_vm15 = vcmp.eq.f32.partialorder %v788_v37, 0.0  ;;  %v285_v11 = vand.u32 2147483648, %v788_v37  ;;  %v869_v19 = vsub.s32 %v513_v5, %v294_v39 }
  0x22   : > { %v684_v40 = vpop.eup %683 }
  0x23   : > { %v686_v41 = vpop.eup %685  ;;  %v232_v55 = vmul.f32 %v684_v40, %v771_v27 }
  0x24   : > { %v688_v42 = vpop.eup %687  ;;  %v239_v59 = vmul.f32 %v686_v41, %v773_v29 }
  0x25   : > { %v690_v43 = vpop.eup %689  ;;  %v246_v60 = vmul.f32 %v688_v42, %v775_v31  ;;  %v234_v4 = vsel %vm233_vm0, %v771_v27, %v232_v55 }
  0x26   : > { %v692_v48 = vpop.eup %691  ;;  %v253_v62 = vmul.f32 %v690_v43, %v777_v33  ;;  %v241_v6 = vsel %vm240_vm2, %v773_v29, %v239_v59  ;;  %v852_v12 = vsel %vm235_vm1, %v236_v49, %v234_v4 }
  0x27   : > { %v694_v50 = vpop.eup %693  ;;  %v260_v63 = vmul.f32 %v692_v48, %v779_v34  ;;  %v248_v7 = vsel %vm247_vm4, %v775_v31, %v246_v60  ;;  %v861_v16 = vsel %vm242_vm3, %v243_v51, %v241_v6  ;;  %v392_v18 = vrot.slane %v852_v12, %v795_v44 }
  0x28   : > { %v696_v52 = vpop.eup %695  ;;  %v267_v0 = vmul.f32 %v694_v50, %v782_v35  ;;  %v255_v9 = vsel %vm254_vm6, %v777_v33, %v253_v62  ;;  %v865_v17 = vsel %vm249_vm5, %v250_v53, %v248_v7  ;;  %v396_v22 = vrot.slane %v861_v16, %v795_v44 }
  0x29   : > { %v698_v54 = vpop.eup %697  ;;  %v274_v2 = vmul.f32 %v696_v52, %v785_v36  ;;  %v262_v10 = vsel %vm261_vm8, %v779_v34, %v260_v63  ;;  %v873_v20 = vsel %vm256_vm7, %v257_v56, %v255_v9  ;;  %v400_v23 = vrot.slane %v865_v17, %v795_v44 }
  0x2a   : > { %v281_v3 = vmul.f32 %v698_v54, %v788_v37  ;;  %v269_v13 = vsel %vm268_vm10, %v782_v35, %v267_v0  ;;  %v877_v21 = vsel %vm263_vm9, %v264_v61, %v262_v10  ;;  %v404_v27 = vrot.slane %v873_v20, %v795_v44 }
  0x2b   : > { %v276_v14 = vsel %vm275_vm12, %v785_v36, %v274_v2  ;;  %v885_v24 = vsel %vm270_vm11, %v271_v1, %v269_v13  ;;  %v408_v28 = vrot.slane %v877_v21, %v795_v44  ;;  %v296_v30 = vrot.slane %v852_v12, %v797_v45 }
  0x2c   : > { %v283_v15 = vsel %vm282_vm13, %v788_v37, %v281_v3  ;;  %v889_v25 = vsel %vm277_vm14, %v278_v8, %v276_v14  ;;  %v412_v29 = vrot.slane %v885_v24, %v795_v44  ;;  %v300_v31 = vrot.slane %v861_v16, %v797_v45 }
  0x2d   : > { %v893_v26 = vsel %vm284_vm15, %v285_v11, %v283_v15  ;;  %v416_v32 = vrot.slane %v889_v25, %v795_v44  ;;  %v304_v34 = vrot.slane %v865_v17, %v797_v45  ;;  %v308_v35 = vrot.slane %v873_v20, %v797_v45 }
  0x2e   : > { %v420_v33 = vrot.slane %v893_v26, %v795_v44  ;;  %v312_v36 = vrot.slane %v877_v21, %v797_v45  ;;  %v316_v37 = vrot.slane %v885_v24, %v797_v45  ;;  %v320_v38 = vrot.slane %v889_v25, %v797_v45 }
  0x2f   : > { %v324_v39 = vrot.slane %v893_v26, %v797_v45  ;;  %v340_v40 = vrot.slane %v852_v12, %v799_v46  ;;  %v344_v41 = vrot.slane %v861_v16, %v799_v46  ;;  %v348_v42 = vrot.slane %v865_v17, %v799_v46 }
  0x30   : > { %v352_v43 = vrot.slane %v873_v20, %v799_v46  ;;  %v356_v44 = vrot.slane %v877_v21, %v799_v46  ;;  %v360_v48 = vrot.slane %v885_v24, %v799_v46  ;;  %v364_v45 = vrot.slane %v889_v25, %v799_v46 }
  0x31   : > { %v368_v49 = vrot.slane %v893_v26, %v799_v46  ;;  %v444_v52 = vrot.slane %v852_v12, %v801_v47  ;;  %v448_v53 = vrot.slane %v861_v16, %v801_v47  ;;  %v452_v54 = vrot.slane %v865_v17, %v801_v47 }
  0x32   : > { %v456_v55 = vrot.slane %v873_v20, %v801_v47  ;;  %v460_v56 = vrot.slane %v877_v21, %v801_v47  ;;  %v464_v46 = vrot.slane %v885_v24, %v801_v47  ;;  %v468_v57 = vrot.slane %v889_v25, %v801_v47 }
  0x33   : > { %v472_v58 = vrot.slane %v893_v26, %v801_v47 }
  0x87   : > { %v291_v50 = vpop.permute.xlu0 %290  ;;  %v387_v51 = vpop.permute.xlu1 %386 }
  0x88   : > { %v421_v59 = vmul.f32 %v392_v18, %v387_v51  ;;  %v422_v60 = vmul.f32 %v396_v22, %v387_v51  ;;  %v423_v61 = vmul.f32 %v400_v23, %v387_v51  ;;  %v424_v62 = vmul.f32 %v404_v27, %v387_v51 }
  0x89   : > { %v425_v63 = vmul.f32 %v408_v28, %v387_v51  ;;  %v426_v0 = vmul.f32 %v412_v29, %v387_v51  ;;  %v427_v1 = vmul.f32 %v416_v32, %v387_v51  ;;  %v428_v2 = vmul.f32 %v420_v33, %v387_v51 }
  0x8a   : > { %v325_v3 = vmul.f32 %v296_v30, %v291_v50  ;;  %v326_v4 = vmul.f32 %v300_v31, %v291_v50  ;;  %v327_v5 = vmul.f32 %v304_v34, %v291_v50  ;;  %v328_v6 = vmul.f32 %v308_v35, %v291_v50 }
  0x8b   : > { %v329_v8 = vmul.f32 %v312_v36, %v291_v50  ;;  %v330_v9 = vmul.f32 %v316_v37, %v291_v50  ;;  %v331_v10 = vmul.f32 %v320_v38, %v291_v50  ;;  %v332_v11 = vmul.f32 %v324_v39, %v291_v50 }
  0x8c   : > { %v335_v7 = vpop.permute.xlu0 %334  ;;  %v439_v20 = vpop.permute.xlu1 %438 }
  0x8d   : > { %v369_v12 = vmul.f32 %v340_v40, %v335_v7  ;;  %v370_v13 = vmul.f32 %v344_v41, %v335_v7  ;;  %v371_v47 = vmul.f32 %v348_v42, %v335_v7  ;;  %v372_v14 = vmul.f32 %v352_v43, %v335_v7 }
  0x8e   : > { %v373_v15 = vmul.f32 %v356_v44, %v335_v7  ;;  %v374_v16 = vmul.f32 %v360_v48, %v335_v7  ;;  %v375_v17 = vmul.f32 %v364_v45, %v335_v7  ;;  %v376_v18 = vmul.f32 %v368_v49, %v335_v7 }
  0x8f   : > { %v377_v21 = vadd.f32 %v369_v12, %v325_v3  ;;  %v378_v22 = vadd.f32 %v370_v13, %v326_v4  ;;  %v379_v23 = vadd.f32 %v371_v47, %v327_v5  ;;  %v380_v24 = vadd.f32 %v372_v14, %v328_v6 }
  0x90   : > { %v381_v25 = vadd.f32 %v373_v15, %v329_v8  ;;  %v382_v26 = vadd.f32 %v374_v16, %v330_v9  ;;  %v383_v27 = vadd.f32 %v375_v17, %v331_v10  ;;  %v384_v28 = vadd.f32 %v376_v18, %v332_v11 }
  0x91   : > { %v429_v29 = vadd.f32 %v421_v59, %v377_v21  ;;  %v430_v30 = vadd.f32 %v422_v60, %v378_v22  ;;  %v431_v31 = vadd.f32 %v423_v61, %v379_v23  ;;  %v432_v32 = vadd.f32 %v424_v62, %v380_v24  ;;  %v491_v41 = vpop.permute.xlu1 %490 }
  0x92   : > { %v433_v33 = vadd.f32 %v425_v63, %v381_v25  ;;  %v434_v34 = vadd.f32 %v426_v0, %v382_v26  ;;  %v435_v35 = vadd.f32 %v427_v1, %v383_v27  ;;  %v436_v36 = vadd.f32 %v428_v2, %v384_v28 }
  0x93   : > { %v473_v37 = vmul.f32 %v444_v52, %v439_v20  ;;  %v474_v38 = vmul.f32 %v448_v53, %v439_v20  ;;  %v475_v39 = vmul.f32 %v452_v54, %v439_v20  ;;  %v476_v40 = vmul.f32 %v456_v55, %v439_v20 }
  0x94   : > { %v477_v42 = vmul.f32 %v460_v56, %v439_v20  ;;  %v478_v43 = vmul.f32 %v464_v46, %v439_v20  ;;  %v479_v44 = vmul.f32 %v468_v57, %v439_v20  ;;  %v480_v48 = vmul.f32 %v472_v58, %v439_v20 }
  0x95   : > { %v481_v45 = vadd.f32 %v473_v37, %v429_v29  ;;  %v482_v49 = vadd.f32 %v474_v38, %v430_v30  ;;  %v483_v50 = vadd.f32 %v475_v39, %v431_v31  ;;  %v484_v51 = vadd.f32 %v476_v40, %v432_v32 }
  0x96   : > { %v485_v59 = vadd.f32 %v477_v42, %v433_v33  ;;  %v486_v60 = vadd.f32 %v478_v43, %v434_v34  ;;  %v487_v61 = vadd.f32 %v479_v44, %v435_v35  ;;  %v488_v62 = vadd.f32 %v480_v48, %v436_v36 }
  0x97   : > { %v493_v63 = vadd.f32 %v491_v41, %v481_v45  ;;  %v494_v0 = vadd.f32 %v491_v41, %v482_v49  ;;  %v495_v52 = vadd.f32 %v491_v41, %v483_v50  ;;  %v496_v53 = vadd.f32 %v491_v41, %v484_v51 }
  0x98   : > { %v497_v54 = vadd.f32 %v491_v41, %v485_v59  ;;  %v498_v55 = vadd.f32 %v491_v41, %v486_v60  ;;  %v499_v1 = vadd.f32 %v491_v41, %v487_v61  ;;  %v500_v56 = vadd.f32 %v491_v41, %v488_v62 }
  0x99   : > { %v509_v46 = vcombine.low %v493_v63, %v494_v0  ;;  %v510_v57 = vcombine.low %v495_v52, %v496_v53 }
  0x9a   : > { %v526_v58 = vcombine.low %v497_v54, %v498_v55  ;;  %v527_v2 = vcombine.low %v499_v1, %v500_v56 }
  0x9b   : > { %v517_v3 = vrot.slane %v509_v46, %v869_v19  ;;  %v524_v4 = vrot.slane %v510_v57, %v869_v19 }
  0x9c   : > { %v534_v5 = vrot.slane %v526_v58, %v869_v19  ;;  %v541_v6 = vrot.slane %v527_v2, %v869_v19 }
  0x9d   : > { %v525_v7 = vcombine.low %v517_v3, %v524_v4 }
  0x9e   : > { %v542_v8 = vcombine.low %v534_v5, %v541_v6 }
  0x9f   : > { %545 = vst [vmem:[%s181_s22] sm:$0xff] %v525_v7 }
  0xa0   : > { %546 = vst [vmem:[%s181_s22 + $0x8] sm:$0xff] %v542_v8 }
  0xa1 PF: > { %s12_s11 = sadd.s32 1, %s721_s11   ;;  %s973_s9 = smov %s717_s10 }
  0xa2   : > { %p9_p5 = scmp.ge.s32.totalorder %s12_s11, 4   ;;  %s974_s10 = smov %s976_s12 }
  0xa4   :  { %11 = sbr.rel (!%p9_p5) target bundleno = 2 (0x2), region = 58 }

</bundles_post_ra>
